<compile_context>
chip_gen: v6e
topology: v6e:2x2x1
jax: 0.10.0
libtpu: 0.0.40
codegen_flags: <defaults>
</compile_context>

<pallas_src>
import functools

import jax
import jax.numpy as jnp
from jax.experimental import pallas as pl
from jax.experimental.pallas import tpu as pltpu


def _odenet_kernel(x_ref, w1_ref, b1_ref, w2_ref, b2_ref, w3_ref, b3_ref,
                   o_ref, *, bf16_sin=False):
    # x_ref:  (1, TN)           batch along lanes
    # w1_ref: (H, 1), b1_ref: (H, 1)
    # w2_ref: (H, H), b2_ref: (H, 1)
    # w3_ref: (2, H), b3_ref: (2, 1)
    # o_ref:  (2, TN)           lane-dense output
    x = x_ref[...]                                            # (1, TN)

    # Layer 1: Linear(1 -> H).  K=1 contraction => VPU broadcast (outer
    # product), no MXU pass / result-FIFO latency.
    pre1 = w1_ref[...] * x + b1_ref[...]                      # (H, TN)
    if bf16_sin:
        h1 = jnp.sin(pre1.astype(jnp.bfloat16))               # bf16 EUP/VPU (v6e/v7x)
    else:
        h1 = jnp.sin(pre1)                                    # (H, TN) f32

    # Layer 2: Linear(H -> H) on the MXU, f32 accumulation.
    h2 = jnp.dot(w2_ref[...].astype(h1.dtype), h1,
                 preferred_element_type=jnp.float32)          # (H, TN) f32
    pre2 = h2 + b2_ref[...]
    if bf16_sin:
        h2a = jnp.sin(pre2.astype(jnp.bfloat16))
    else:
        h2a = jnp.sin(pre2)                                   # (H, TN)

    # Output layer: Linear(H -> 2), lane-dense (2, TN) store.
    out = jnp.dot(w3_ref[...].astype(h2a.dtype), h2a,
                  preferred_element_type=jnp.float32)         # (2, TN)
    o_ref[...] = (out + b3_ref[...]).astype(o_ref.dtype)


def _round_up(a, m):
    return ((a + m - 1) // m) * m


def odenet_forward(x, params, *, tn=8192, use_bf16_sin=False):
    """Pallas forward pass.

    x: (N, 1) float32.  Returns (x_N, px_N), each (N, 1), matching the torch
    module's forward.  use_bf16_sin=True is only recommended on v6e/v7x and
    loosens accuracy to ~1e-2.
    """
    w1, b1, w2, b2, w3, b3 = params
    n = x.shape[0]
    hidden = w2.shape[0]

    xt = x.reshape(1, n).astype(jnp.float32)                  # batch -> lanes

    # Lane-dense batch axis: pad N up to a multiple of 128 lanes.
    lane = 128
    n_pad = _round_up(max(n, 1), lane)

    # Big tiles amortize the ~0.35 us per-grid-step overhead; cap so the
    # grid keeps >= 2 steps when possible (v7x megacore sharding of the
    # "parallel" axis).  v5e/v6e (1 TC) just take the biggest tile <= tn.
    tile = _round_up(min(tn, n_pad), lane)
    if n_pad // tile < 2 and n_pad >= 2 * lane:
        tile = min(tile, _round_up(pl.cdiv(n_pad, 2), lane))
    n_pad = _round_up(n_pad, tile)
    grid = (n_pad // tile,)

    n_params = w1.size + b1.size + w2.size + b2.size + w3.size + b3.size
    cost = pl.CostEstimate(
        flops=int(2 * n_pad * hidden * hidden        # fc2
                  + 2 * n_pad * hidden * 2           # out layer
                  + 2 * n_pad * hidden),             # fc1 (broadcast FMA)
        transcendentals=int(2 * n_pad * hidden),     # two sin layers
        bytes_accessed=int(4 * (n_pad * 1 + n_pad * 2 + n_params)),
    )

    if n_pad != n:
        xt = jnp.pad(xt, ((0, 0), (0, n_pad - n)))

    # v5e guardrail: only needed if the tile is pushed well past the scoped
    # default (not triggered at the default tn=8192).
    if tile > 16384:
        compiler_params = pltpu.CompilerParams(
            dimension_semantics=("parallel",),
            vmem_limit_bytes=64 * 1024 * 1024)
    else:
        compiler_params = pltpu.CompilerParams(
            dimension_semantics=("parallel",))

    kernel = functools.partial(_odenet_kernel, bf16_sin=use_bf16_sin)

    out = pl.pallas_call(
        kernel,
        out_shape=jax.ShapeDtypeStruct((2, n_pad), jnp.float32),
        grid_spec=pltpu.PrefetchScalarGridSpec(
            num_scalar_prefetch=0,
            grid=grid,
            in_specs=[
                pl.BlockSpec((1, tile), lambda i: (0, i)),            # x tile
                pl.BlockSpec((hidden, 1), lambda i: (0, 0)),          # w1
                pl.BlockSpec((hidden, 1), lambda i: (0, 0)),          # b1
                pl.BlockSpec((hidden, hidden), lambda i: (0, 0)),     # w2
                pl.BlockSpec((hidden, 1), lambda i: (0, 0)),          # b2
                pl.BlockSpec((2, hidden), lambda i: (0, 0)),          # w3
                pl.BlockSpec((2, 1), lambda i: (0, 0)),               # b3
            ],
            out_specs=pl.BlockSpec((2, tile), lambda i: (0, i)),
        ),
        compiler_params=compiler_params,
        cost_estimate=cost,
    )(xt, w1, b1, w2, b2, w3, b3)

    # Single trim of the lane-dense slab, then a cheap row split.
    out = out[:, :n]                                           # (2, N)
    x_N = out[0:1, :].T                                        # (N, 1)
    px_N = out[1:2, :].T                                       # (N, 1)
    return x_N, px_N


def init_params(key, hidden=32):
    """Deterministic init matching torch.nn.Linear (weights in (out, in) layout,
    biases as column vectors)."""
    k1, k2, k3, k4, k5, k6 = jax.random.split(key, 6)

    def uniform(k, shape, fan_in):
        bound = 1.0 / jnp.sqrt(jnp.float32(fan_in))
        return jax.random.uniform(k, shape, jnp.float32, -bound, bound)

    # fc1: Linear(1, hidden)      -> w1: (hidden, 1)
    w1 = uniform(k1, (hidden, 1), 1)
    b1 = uniform(k2, (hidden, 1), 1)
    # fc2: Linear(hidden, hidden) -> w2: (hidden, hidden)
    w2 = uniform(k3, (hidden, hidden), hidden)
    b2 = uniform(k4, (hidden, 1), hidden)
    # out: Linear(hidden, 2)      -> w3: (2, hidden)
    w3 = uniform(k5, (2, hidden), hidden)
    b3 = uniform(k6, (2, 1), hidden)
    return (w1, b1, w2, b2, w3, b3)


def reference_forward(x, params):
    """Plain-JAX reference (row layout) for correctness checking."""
    w1, b1, w2, b2, w3, b3 = params
    h1 = jnp.sin(x @ w1.T + b1.T)
    h2 = jnp.sin(h1 @ w2.T + b2.T)
    out = h2 @ w3.T + b3.T
    return out[:, 0].reshape(-1, 1), out[:, 1].reshape(-1, 1)


if __name__ == "__main__":
    key = jax.random.PRNGKey(0)
    k_param, k_x = jax.random.split(key)

    hidden = 32
    batch = 200  # deliberately not a multiple of 128 to exercise the padded tail
    params = init_params(k_param, hidden=hidden)
    x = jax.random.uniform(k_x, (batch, 1), jnp.float32, 0.0, 2.0)

    # Default f32 path (bf16-sin is an opt-in knob for v6e/v7x only).
    x_N, px_N = odenet_forward(x, params)
    x_N = jax.block_until_ready(x_N)
    px_N = jax.block_until_ready(px_N)

    x_N_ref, px_N_ref = reference_forward(x, params)
    assert x_N.shape == (batch, 1) and px_N.shape == (batch, 1)
    assert jnp.allclose(x_N, x_N_ref, atol=1e-5, rtol=1e-5)
    assert jnp.allclose(px_N, px_N_ref, atol=1e-5, rtol=1e-5)

    print("KERNEL_OK")
</pallas_src>

<mosaic_0001>
module attributes {stable_mosaic.version = 11 : i64} {
  func.func @_odenet_kernel(%arg0: i32, %arg1: memref<1x128xf32, #tpu.memory_space<vmem>>, %arg2: memref<32x1xf32, #tpu.memory_space<vmem>>, %arg3: memref<32x1xf32, #tpu.memory_space<vmem>>, %arg4: memref<32x32xf32, #tpu.memory_space<vmem>>, %arg5: memref<32x1xf32, #tpu.memory_space<vmem>>, %arg6: memref<2x32xf32, #tpu.memory_space<vmem>>, %arg7: memref<2x1xf32, #tpu.memory_space<vmem>>, %arg8: memref<2x128xf32, #tpu.memory_space<vmem>>) attributes {dimension_semantics = [#tpu.dimension_semantics<parallel>], iteration_bounds = array<i64: 2>, scalar_prefetch = 0 : i64, scratch_operands = 0 : i64, tpu.core_type = #tpu.core_type<tc>, window_params = [{transform_indices = @transform_0, window_bounds = array<i64: 1, 128>}, {pipeline_mode = #tpu.pipeline_mode<synchronous>, transform_indices = @transform_1, window_bounds = array<i64: 32, 1>}, {pipeline_mode = #tpu.pipeline_mode<synchronous>, transform_indices = @transform_2, window_bounds = array<i64: 32, 1>}, {pipeline_mode = #tpu.pipeline_mode<synchronous>, transform_indices = @transform_3, window_bounds = array<i64: 32, 32>}, {pipeline_mode = #tpu.pipeline_mode<synchronous>, transform_indices = @transform_4, window_bounds = array<i64: 32, 1>}, {pipeline_mode = #tpu.pipeline_mode<synchronous>, transform_indices = @transform_5, window_bounds = array<i64: 2, 32>}, {pipeline_mode = #tpu.pipeline_mode<synchronous>, transform_indices = @transform_6, window_bounds = array<i64: 2, 1>}, {transform_indices = @transform_7, window_bounds = array<i64: 2, 128>}]} {
    %c0 = arith.constant 0 : index
    %c0_0 = arith.constant 0 : index
    %0 = vector.load %arg1[%c0, %c0_0] : memref<1x128xf32, #tpu.memory_space<vmem>>, vector<1x128xf32>
    %c0_1 = arith.constant 0 : index
    %c0_2 = arith.constant 0 : index
    %1 = vector.load %arg2[%c0_1, %c0_2] : memref<32x1xf32, #tpu.memory_space<vmem>>, vector<32x1xf32>
    %2 = vector.broadcast %1 : vector<32x1xf32> to vector<32x128xf32>
    %3 = vector.broadcast %0 : vector<1x128xf32> to vector<32x128xf32>
    %4 = arith.mulf %2, %3 : vector<32x128xf32>
    %c0_3 = arith.constant 0 : index
    %c0_4 = arith.constant 0 : index
    %5 = vector.load %arg3[%c0_3, %c0_4] : memref<32x1xf32, #tpu.memory_space<vmem>>, vector<32x1xf32>
    %6 = vector.broadcast %5 : vector<32x1xf32> to vector<32x128xf32>
    %7 = arith.addf %4, %6 : vector<32x128xf32>
    %8 = math.sin %7 : vector<32x128xf32>
    %c0_5 = arith.constant 0 : index
    %c0_6 = arith.constant 0 : index
    %9 = vector.load %arg4[%c0_5, %c0_6] : memref<32x32xf32, #tpu.memory_space<vmem>>, vector<32x32xf32>
    %cst = arith.constant dense<0.000000e+00> : vector<32x128xf32>
    %10 = tpu.matmul %9, %8, %cst {dimension_numbers = #tpu.dot_dimension_numbers<[1], [0], [0], [1], [0, 0, 1, 1], [], []>} : vector<32x32xf32>, vector<32x128xf32>, vector<32x128xf32> -> vector<32x128xf32>
    %c0_7 = arith.constant 0 : index
    %c0_8 = arith.constant 0 : index
    %11 = vector.load %arg5[%c0_7, %c0_8] : memref<32x1xf32, #tpu.memory_space<vmem>>, vector<32x1xf32>
    %12 = vector.broadcast %11 : vector<32x1xf32> to vector<32x128xf32>
    %13 = arith.addf %10, %12 : vector<32x128xf32>
    %14 = math.sin %13 : vector<32x128xf32>
    %c0_9 = arith.constant 0 : index
    %c0_10 = arith.constant 0 : index
    %15 = vector.load %arg6[%c0_9, %c0_10] : memref<2x32xf32, #tpu.memory_space<vmem>>, vector<2x32xf32>
    %cst_11 = arith.constant dense<0.000000e+00> : vector<2x128xf32>
    %16 = tpu.matmul %15, %14, %cst_11 {dimension_numbers = #tpu.dot_dimension_numbers<[1], [0], [0], [1], [0, 0, 1, 1], [], []>} : vector<2x32xf32>, vector<32x128xf32>, vector<2x128xf32> -> vector<2x128xf32>
    %c0_12 = arith.constant 0 : index
    %c0_13 = arith.constant 0 : index
    %17 = vector.load %arg7[%c0_12, %c0_13] : memref<2x1xf32, #tpu.memory_space<vmem>>, vector<2x1xf32>
    %18 = vector.broadcast %17 : vector<2x1xf32> to vector<2x128xf32>
    %19 = arith.addf %16, %18 : vector<2x128xf32>
    %c0_14 = arith.constant 0 : index
    %c0_15 = arith.constant 0 : index
    %20 = vector.load %arg8[%c0_14, %c0_15] : memref<2x128xf32, #tpu.memory_space<vmem>>, vector<2x128xf32>
    tpu.vector_store %arg8[%c0_14, %c0_15], %19 {strides = array<i32>} : memref<2x128xf32, #tpu.memory_space<vmem>>, vector<2x128xf32>,
    return
  }
  func.func @transform_0(%arg0: i32) -> (i32, i32) {
    %c0_i32 = arith.constant 0 : i32
    %c0_i32_0 = arith.constant 0 : i32
    return %c0_i32, %arg0 : i32, i32
  }
  func.func @transform_1(%arg0: i32) -> (i32, i32) {
    %c0_i32 = arith.constant 0 : i32
    %c0_i32_0 = arith.constant 0 : i32
    %c0_i32_1 = arith.constant 0 : i32
    return %c0_i32, %c0_i32_0 : i32, i32
  }
  func.func @transform_2(%arg0: i32) -> (i32, i32) {
    %c0_i32 = arith.constant 0 : i32
    %c0_i32_0 = arith.constant 0 : i32
    %c0_i32_1 = arith.constant 0 : i32
    return %c0_i32, %c0_i32_0 : i32, i32
  }
  func.func @transform_3(%arg0: i32) -> (i32, i32) {
    %c0_i32 = arith.constant 0 : i32
    %c0_i32_0 = arith.constant 0 : i32
    %c0_i32_1 = arith.constant 0 : i32
    return %c0_i32, %c0_i32_0 : i32, i32
  }
  func.func @transform_4(%arg0: i32) -> (i32, i32) {
    %c0_i32 = arith.constant 0 : i32
    %c0_i32_0 = arith.constant 0 : i32
    %c0_i32_1 = arith.constant 0 : i32
    return %c0_i32, %c0_i32_0 : i32, i32
  }
  func.func @transform_5(%arg0: i32) -> (i32, i32) {
    %c0_i32 = arith.constant 0 : i32
    %c0_i32_0 = arith.constant 0 : i32
    %c0_i32_1 = arith.constant 0 : i32
    return %c0_i32, %c0_i32_0 : i32, i32
  }
  func.func @transform_6(%arg0: i32) -> (i32, i32) {
    %c0_i32 = arith.constant 0 : i32
    %c0_i32_0 = arith.constant 0 : i32
    %c0_i32_1 = arith.constant 0 : i32
    return %c0_i32, %c0_i32_0 : i32, i32
  }
  func.func @transform_7(%arg0: i32) -> (i32, i32) {
    %c0_i32 = arith.constant 0 : i32
    %c0_i32_0 = arith.constant 0 : i32
    return %c0_i32, %arg0 : i32, i32
  }
}

</mosaic_0001>

<bundles_post_ra>
// kernel: tpu_custom_call.1
= control target key start
LH: loop header
LB: loop body
LE: loop exit
PB: predicated region body
PF: predicated region fallthrough
CT: control target
= control target key end

     0   :  { %12 = vsyncpa [#allocation3], 0  ;;  %s2498_s0 = inlined_call_operand.vmem [shape: f32[1,256], index: 0, kind: input, shape index: {}]   ;;  %s2499_s1 = inlined_call_operand.vmem [shape: f32[32,1], index: 1, kind: input, shape index: {}]   ;;  %s2500_s2 = inlined_call_operand.vmem [shape: f32[32,1], index: 2, kind: input, shape index: {}]   ;;  %s2501_s3 = inlined_call_operand.vmem [shape: f32[32,32], index: 3, kind: input, shape index: {}]   ;;  %s2502_s4 = inlined_call_operand.vmem [shape: f32[32,1], index: 4, kind: input, shape index: {}]   ;;  %s2503_s5 = inlined_call_operand.vmem [shape: f32[2,32], index: 5, kind: input, shape index: {}]   ;;  %s2504_s6 = inlined_call_operand.vmem [shape: f32[2,1], index: 6, kind: input, shape index: {}]   ;;  %s2505_s7 = inlined_call_operand.hbm [shape: f32[2,256], index: 7, kind: output, shape index: {}]  }
   0x1   :  { %14 = vsyncpa [#allocation3 + $0x1], 0  ;;  %s1754_s24 = smov 0   ;;  %s1756_s25 = smov 0  }
   0x2   :  { %s1758_s26 = smov 0   ;;  %s1760_s27 = smov 0  }
   0x3 LB: > { %s1775_s28 = sadd.s32 4294967295, %s1702_s27   ;;  %s1443_s29 = sadd.s32 4294967294, %s1702_s27   ;;  %s1702_s27 = sphi %s1760_s27, %s2527_s27   ;;  %s1698_s26 = sphi %s1758_s26, %s2526_s26   ;;  %s1694_s25 = sphi %s1756_s25, %s2525_s25   ;;  %s1690_s24 = sphi %s1754_s24, %s2524_s24  }
   0x4   : > { %s1779_s30 = sadd.s32 1, %s1702_s27   ;;  %s179_s8 = sadd.s32 1, %s1698_s26 }
   0x5   : > { %s176_s9 = ssub.s32 %s1702_s27, %s1779_s30  ;;  %p189_p0 = scmp.ne.s32.totalorder %s1698_s26, %s1694_s25 }
   0x6   : > { %p177_p1 = scmp.eq.s32.totalorder %s176_s9, 0  ;;  %p190_p2 = scmp.eq.s32.totalorder %s1775_s28, 1 }
   0x7   : > { %p195_p3 = scmp.ne.s32.totalorder %s1694_s25, %s1690_s24  ;;  %p196_p4 = scmp.eq.s32.totalorder %s1443_s29, 1 }
   0x8   : > { %s1790_s10 = scalar_select %p177_p1, %s1698_s26, %s179_s8  }
   0x9   : > { %p1792_p5 = por %p190_p2, %p189_p0  ;;  %p1796_p6 = por %p196_p4, %p195_p3 }
   0xa   : > { %p1446_p7 = scmp.ge.s32.totalorder %s1702_s27, 1  ;;  %p238_p8 = scmp.lt.s32.totalorder %s1702_s27, 3 }
   0xc   : > { %p239_p9 = pnand %p1446_p7, %p238_p8 }
   0xd   : > { %p268_p10 = scmp.lt.s32.totalorder (!%p239_p9), %s1775_s28, 1  ;;  %s1487_s13 = sshll.u32 (!%p239_p9), %s1775_s28, 5 }
   0xe   : > { %242 = sbr.rel (%p239_p9) target bundleno = 818 (0x332), region = 48  ;;  %s2463_s18 = scalar_lea.hbm (!%p239_p9), %s2505_s7, %s1487_s13 }
  0x13   : > { %v309_v0 = vld [vmem:[%s2500_s2 + $0x18] sm:$0xff]  ;;  %v1704_v2 = vmov 0   ;;  %v274_v3 = vld [vmem:[%s2499_s1 + $0x10] sm:$0xff]  ;;  %v273_v4 = vld [vmem:[%s2499_s1 + $0x8] sm:$0xff]  ;;  %s269_s8 = scalar_select %p268_p10, %s1775_s28, 1 }
  0x14   : > { %v275_v1 = vld [vmem:[%s2499_s1 + $0x18] sm:$0xff]  ;;  %1609 = vset.pattern.permute.xlu1 %v1704_v2  ;;  %1608 = vset.pattern.permute.xlu0 %v1704_v2  ;;  %v308_v5 = vld [vmem:[%s2500_s2 + $0x10] sm:$0xff]  ;;  %v272_v6 = vld [vmem:[%s2499_s1] sm:$0xff]  ;;  %v1705_v59 = vmov 683565275   ;;  %s1713_s28 = smov [#allocation2]  }
  0x15   : > { %327 = vperm.xlu1 %1609, %v309_v0   ;;  %293 = vperm.xlu0 %1608, %v275_v1   ;;  %v307_v7 = vld [vmem:[%s2500_s2 + $0x8] sm:$0xff]  ;;  %v306_v8 = vld [vmem:[%s2500_s2] sm:$0xff]  ;;  %v757_v9 = vld [vmem:[%s2502_s4 + $0x18] sm:$0xff]  ;;  %s270_s14 = scalar_lea.vmem %s2498_s0, %s269_s8  ;;  %v1706_v61 = vmov 2475754826   ;;  %s265_s8 = sand.u32 1, %s1694_s25  }
  0x16   : > { %v756_v10 = vld [vmem:[%s2502_s4 + $0x10] sm:$0xff]  ;;  %v755_v11 = vld [vmem:[%s2502_s4 + $0x8] sm:$0xff]  ;;  %v754_v12 = vld [vmem:[%s2502_s4] sm:$0xff]  ;;  %v1707_v0 = vmov 2131351028   ;;  %s1447_s9 = sshll.u32 %s265_s8, 1 }
  0x17   : > { %v1293_v13 = vld [vmem:[%s2504_s6] sm:$0x3]  ;;  %v1708_v2 = vmov 2102212464   ;;  %s1374_s19 = scalar_lea.sflag [#allocation3], %s265_s8  ;;  %s1646_s21 = sshll.u32 %s1713_s28, 4  ;;  %s1647_s21 = int_to_ptr.vmem [resolvable:$false] %s1646_s21 }
  0x18   : > { %v1448_v14 = vld [vmem:[%s270_s14] ss:$0 sm:$0xff]  ;;  %s267_s14 = scalar_lea.vmem [#allocation2], %s1447_s9  ;;  %s1648_s22 = scalar_lea.vmem %s1647_s21, 64 }
  0x19   : > { %288 = vperm.xlu0 %1608, %v274_v3   ;;  %283 = vperm.xlu1 %1609, %v273_v4   ;;  %v1709_v4 = vmov 920167782   ;;  %s1387_s15 = sshll.u32 %s267_s14, 4  ;;  %s1388_s15 = int_to_ptr.vmem [resolvable:$true] %s1387_s15 }
  0x1a   : > { %s1642_s20 = scalar_lea.vmem %s1388_s15, 32  ;;  %p1649_p0 = scmp.lt.s32.totalorder %s1388_s15, %s1647_s21 }
  0x1b   : > { %p1643_p11 = scmp.ne.s32.totalorder %s1388_s15, %s1642_s20  ;;  %p1650_p1 = scmp.lt.s32.totalorder %s1648_s22, %s1642_s20 }
  0x1d   : > { %322 = vperm.xlu0 %1608, %v308_v5   ;;  %278 = vperm.xlu1 %1609, %v272_v6   ;;  %p1644_p12 = pnand %p1643_p11, %p1792_p5  ;;  %p1651_p2 = por %p1650_p1, %p1649_p0 }
  0x1f   : > { %p1645_p13 = pneg %p1644_p12 }
  0x21   : > { %317 = vperm.xlu0 %1608, %v307_v7   ;;  %312 = vperm.xlu1 %1609, %v306_v8   ;;  %p1652_p3 = pnand %p1651_p2, %p1645_p13 }
  0x25   : > { %775 = vperm.xlu0 %1608, %v757_v9   ;;  %770 = vperm.xlu1 %1609, %v756_v10  }
  0x29   : > { %765 = vperm.xlu0 %1608, %v755_v11   ;;  %760 = vperm.xlu1 %1609, %v754_v12   ;;  %v1710_v11 = vmov 1326507024  }
  0x2d   : > { %1296 = vperm.xlu0 %1608, %v1293_v13  }
  0x90   : > { %v328_v15 = vpop.permute.xlu1 %327  ;;  %v294_v16 = vpop.permute.xlu0 %293 }
  0x91   : > { %v305_v17 = vmul.f32 %v1448_v14, %v294_v16 }
  0x93   : > { %v1846_v18 = vadd.f32 %v328_v15, %v305_v17 }
  0x94   : > { %v289_v19 = vpop.permute.xlu0 %288  ;;  %v284_v20 = vpop.permute.xlu1 %283 }
  0x95   : > { %v649_v21 = vand.u32 2139095040, %v1846_v18  ;;  %v304_v23 = vmul.f32 %v1448_v14, %v289_v19  ;;  %v303_v28 = vmul.f32 %v1448_v14, %v284_v20 }
  0x97   : > { %v650_v22 = vshrl.u32 %v649_v21, 23 }
  0x98   : > { %v323_v24 = vpop.permute.xlu0 %322  ;;  %v279_v25 = vpop.permute.xlu1 %278 }
  0x99   : > { %v1461_v26 = vadd.s32 4294967169, %v650_v22  ;;  %v1849_v27 = vadd.f32 %v323_v24, %v304_v23  ;;  %v302_v31 = vmul.f32 %v1448_v14, %v279_v25 }
  0x9b   : > { %v542_v29 = vand.u32 2147483647, %v1849_v27  ;;  %v545_v30 = vand.u32 2139095040, %v1849_v27  ;;  %v656_v34 = vadd.s32 1, %v1461_v26 }
  0x9c   : > { %v318_v32 = vpop.permute.xlu0 %317  ;;  %v313_v33 = vpop.permute.xlu1 %312 }
  0x9d   : > { %v546_v35 = vshrl.u32 %v545_v30, 23  ;;  %v549_v36 = vand.u32 8388607, %v542_v29  ;;  %v1855_v37 = vadd.f32 %v318_v32, %v303_v28  ;;  %v1857_v38 = vadd.f32 %v313_v33, %v302_v31 }
  0x9e   : > { %vm657_vm0 = vcmp.gt.s32.totalorder %v656_v34, 0 }
  0x9f   : > { %v1457_v39 = vadd.s32 4294967169, %v546_v35  ;;  %v438_v40 = vand.u32 2147483647, %v1855_v37  ;;  %v441_v41 = vand.u32 2139095040, %v1855_v37  ;;  %v550_v42 = vor.u32 8388608, %v549_v36 }
  0xa0   : > { %v334_v46 = vand.u32 2147483647, %v1857_v38  ;;  %v337_v47 = vand.u32 2139095040, %v1857_v38  ;;  %v1865_v51 = vsel %vm657_vm0, %v656_v34, 0 }
  0xa1   : > { %v552_v43 = vadd.s32 1, %v1457_v39  ;;  %v442_v44 = vshrl.u32 %v441_v41, 23  ;;  %v445_v45 = vand.u32 8388607, %v438_v40  ;;  %v1867_v54 = vshll.u32 %v550_v42, 8 }
  0xa2   : > { %v338_v50 = vshrl.u32 %v337_v47, 23  ;;  %v1871_v57 = vand.u32 8388607, %v334_v46 }
  0xa3   : > { %vm553_vm1 = vcmp.gt.s32.totalorder %v552_v43, 0  ;;  %v1453_v49 = vadd.s32 4294967169, %v442_v44  ;;  %v446_v55 = vor.u32 8388608, %v445_v45 }
  0xa4   : > { %v554_v48 = vsel %vm553_vm1, %v552_v43, 0  ;;  %v1449_v63 = vadd.s32 4294967169, %v338_v50 }
  0xa5   : > { %v555_v52 = vshrl.u32 %v554_v48, 5  ;;  %v556_v53 = vand.u32 31, %v554_v48  ;;  %v448_v56 = vadd.s32 1, %v1453_v49  ;;  %v1893_v36 = vshll.u32 %v446_v55, 8 }
  0xa6   : > { %v344_v39 = vadd.s32 1, %v1449_v63 }
  0xa7   : > { %v557_v58 = vsub.s32 32, %v556_v53  ;;  %v559_v60 = vshll.u32 %v1705_v59, %v556_v53  ;;  %v562_v62 = vshll.u32 %v1706_v61, %v556_v53  ;;  %v565_v1 = vshll.u32 %v1707_v0, %v556_v53 }
  0xa8   : > { %v568_v3 = vshll.u32 %v1708_v2, %v556_v53  ;;  %v571_v5 = vshll.u32 %v1709_v4, %v556_v53  ;;  %vm574_vm2 = vcmp.lt.s32.totalorder %v555_v52, 1  ;;  %vm575_vm3 = vcmp.lt.s32.totalorder %v555_v52, 2 }
  0xa9   : > { %v560_v6 = vshrl.u32 %v1706_v61, %v557_v58  ;;  %v563_v7 = vshrl.u32 %v1707_v0, %v557_v58  ;;  %v566_v8 = vshrl.u32 %v1708_v2, %v557_v58  ;;  %v558_v9 = vshrl.u32 %v1705_v59, %v557_v58 }
  0xaa   : > { %v569_v10 = vshrl.u32 %v1709_v4, %v557_v58  ;;  %v572_v12 = vshrl.u32 %v1710_v11, %v557_v58  ;;  %vm576_vm4 = vcmp.lt.s32.totalorder %v555_v52, 3  ;;  %vm449_vm5 = vcmp.gt.s32.totalorder %v448_v56, 0 }
  0xab   : > { %v561_v13 = vor.u32 %v560_v6, %v559_v60  ;;  %v564_v14 = vor.u32 %v563_v7, %v562_v62  ;;  %v567_v15 = vor.u32 %v566_v8, %v565_v1  ;;  %vm577_vm6 = vcmp.lt.s32.totalorder %v555_v52, 4 }
  0xac   : > { %v570_v16 = vor.u32 %v569_v10, %v568_v3  ;;  %v573_v17 = vor.u32 %v572_v12, %v571_v5  ;;  %v450_v19 = vsel %vm449_vm5, %v448_v56, 0  ;;  %vm345_vm11 = vcmp.gt.s32.totalorder %v344_v39, 0 }
  0xad   : > { %v578_v20 = vsel %vm574_vm2, %v558_v9, %v561_v13  ;;  %v579_v21 = vsel %vm577_vm6, %v567_v15, 2102212464  ;;  %v582_v22 = vsel %vm574_vm2, %v561_v13, %v564_v14  ;;  %v586_v23 = vsel %vm574_vm2, %v564_v14, %v567_v15 }
  0xae   : > { %v580_v24 = vsel %vm576_vm4, %v564_v14, %v579_v21  ;;  %v583_v25 = vsel %vm577_vm6, %v570_v16, 920167782  ;;  %v587_v26 = vsel %vm577_vm6, %v573_v17, 1326507024  ;;  %v451_v28 = vshrl.u32 %v450_v19, 5 }
  0xaf   : > { %v581_v30 = vsel %vm575_vm3, %v578_v20, %v580_v24  ;;  %v584_v31 = vsel %vm576_vm4, %v567_v15, %v583_v25  ;;  %v588_v32 = vsel %vm576_vm4, %v570_v16, %v587_v26  ;;  %v452_v33 = vand.u32 31, %v450_v19 }
  0xb0   : > { %v585_v34 = vsel %vm575_vm3, %v582_v22, %v584_v31  ;;  %v589_v35 = vsel %vm575_vm3, %v586_v23, %v588_v32  ;;  %v597_v45 = vmul.u32 %v1867_v54, %v581_v30  ;;  %vm470_vm7 = vcmp.lt.s32.totalorder %v451_v28, 1 }
  0xb1   : > { %v1896_v41 = vmul.u32.u64.low %v1867_v54, %v589_v35  ;;  %v1897_v42 = vmul.u32.u64.high %v1867_v54, %v589_v35, %v1896_v41  ;;  %v1900_v43 = vmul.u32.u64.low %v1867_v54, %v585_v34  ;;  %v1901_v44 = vmul.u32.u64.high %v1867_v54, %v585_v34, %v1900_v43 }
  0xb2   : > { %v453_v47 = vsub.s32 32, %v452_v33  ;;  %v455_v48 = vshll.u32 %v1705_v59, %v452_v33  ;;  %v458_v49 = vshll.u32 %v1706_v61, %v452_v33  ;;  %v461_v50 = vshll.u32 %v1707_v0, %v452_v33 }
  0xb3   : > { %v464_v52 = vshll.u32 %v1708_v2, %v452_v33  ;;  %v467_v53 = vshll.u32 %v1709_v4, %v452_v33  ;;  %vm472_vm8 = vcmp.lt.s32.totalorder %v451_v28, 3  ;;  %vm599_vm9 = vc.u32 %v1897_v42, %v1900_v43 }
  0xb4   : > { %v456_v55 = vshrl.u32 %v1706_v61, %v453_v47  ;;  %v459_v56 = vshrl.u32 %v1707_v0, %v453_v47  ;;  %v462_v58 = vshrl.u32 %v1708_v2, %v453_v47  ;;  %v600_v54 = vadd.s32 1, %v1901_v44 }
  0xb5   : > { %v454_v60 = vshrl.u32 %v1705_v59, %v453_v47  ;;  %v465_v62 = vshrl.u32 %v1709_v4, %v453_v47  ;;  %v468_v5 = vshrl.u32 %v1710_v11, %v453_v47  ;;  %vm473_vm10 = vcmp.lt.s32.totalorder %v451_v28, 4 }
  0xb6   : > { %v457_v63 = vor.u32 %v456_v55, %v455_v48  ;;  %v460_v1 = vor.u32 %v459_v56, %v458_v49  ;;  %v463_v3 = vor.u32 %v462_v58, %v461_v50  ;;  %v601_v6 = vsel %vm599_vm9, %v600_v54, %v1901_v44 }
  0xb7   : > { %v466_v7 = vor.u32 %v465_v62, %v464_v52  ;;  %v602_v8 = vadd.s32 %v601_v6, %v597_v45  ;;  %v469_v9 = vor.u32 %v468_v5, %v467_v53  ;;  %vm471_vm12 = vcmp.lt.s32.totalorder %v451_v28, 2 }
  0xb8   : > { %v474_v10 = vsel %vm470_vm7, %v454_v60, %v457_v63  ;;  %v475_v12 = vsel %vm473_vm10, %v463_v3, 2102212464  ;;  %v478_v14 = vsel %vm470_vm7, %v457_v63, %v460_v1  ;;  %v482_v16 = vsel %vm470_vm7, %v460_v1, %v463_v3 }
  0xb9   : > { %v476_v13 = vsel %vm472_vm8, %v460_v1, %v475_v12  ;;  %v479_v15 = vsel %vm473_vm10, %v466_v7, 920167782  ;;  %v603_v17 = vadd.s32 536870912, %v602_v8  ;;  %v483_v20 = vsel %vm473_vm10, %v469_v9, 1326507024 }
  0xba   : > { %v480_v19 = vsel %vm472_vm8, %v463_v3, %v479_v15  ;;  %v477_v21 = vsel %vm471_vm12, %v474_v10, %v476_v13  ;;  %v484_v23 = vsel %vm472_vm8, %v466_v7, %v483_v20  ;;  %v346_v24 = vsel %vm345_vm11, %v344_v39, 0 }
  0xbb   : > { %v481_v22 = vsel %vm471_vm12, %v478_v14, %v480_v19  ;;  %v1927_v25 = vshrl.u32 %v603_v17, 30  ;;  %v485_v26 = vsel %vm471_vm12, %v482_v16, %v484_v23  ;;  %v348_v34 = vand.u32 31, %v346_v24 }
  0xbc   : > { %v1930_v30 = vmul.u32.u64.low %v1893_v36, %v481_v22  ;;  %v1931_v31 = vmul.u32.u64.high %v1893_v36, %v481_v22, %v1930_v30  ;;  %v1935_v32 = vmul.u32.u64.low %v1893_v36, %v485_v26  ;;  %v1936_v33 = vmul.u32.u64.high %v1893_v36, %v485_v26, %v1935_v32 }
  0xbd   : > { %v1939_v35 = vand.u32 31, %v1865_v51  ;;  %v605_v28 = vshll.u32 %v1927_v25, 30  ;;  %v646_v39 = vand.u32 2147483647, %v1846_v18  ;;  %v493_v41 = vmul.u32 %v1893_v36, %v477_v21 }
  0xbe   : > { %v342_v44 = vor.u32 8388608, %v1871_v57  ;;  %v347_v45 = vshrl.u32 %v346_v24, 5  ;;  %v349_v47 = vsub.s32 32, %v348_v34  ;;  %v496_v49 = vadd.s32 1, %v1931_v31 }
  0xbf   : > { %v1945_v48 = vsub.s32 %v602_v8, %v605_v28  ;;  %v351_v50 = vshll.u32 %v1705_v59, %v348_v34  ;;  %v354_v52 = vshll.u32 %v1706_v61, %v348_v34  ;;  %vm495_vm13 = vc.u32 %v1936_v33, %v1930_v30 }
  0xc0   : > { %v352_v53 = vshrl.u32 %v1706_v61, %v349_v47  ;;  %v357_v55 = vshll.u32 %v1707_v0, %v348_v34  ;;  %v360_v36 = vshll.u32 %v1708_v2, %v348_v34  ;;  %v497_v57 = vsel %vm495_vm13, %v496_v49, %v1931_v31 }
  0xc1   : > { %v355_v56 = vshrl.u32 %v1707_v0, %v349_v47  ;;  %v358_v58 = vshrl.u32 %v1708_v2, %v349_v47  ;;  %v363_v54 = vshll.u32 %v1709_v4, %v348_v34  ;;  %v498_v60 = vadd.s32 %v497_v57, %v493_v41 }
  0xc2   : > { %v353_v62 = vor.u32 %v352_v53, %v351_v50  ;;  %v361_v63 = vshrl.u32 %v1709_v4, %v349_v47  ;;  %v364_v1 = vshrl.u32 %v1710_v11, %v349_v47  ;;  %v1962_v3 = vsub.s32 32, %v1939_v35 }
  0xc3   : > { %v608_v5 = vsub.s32 0, %v1945_v48  ;;  %v356_v6 = vor.u32 %v355_v56, %v354_v52  ;;  %v359_v7 = vor.u32 %v358_v58, %v357_v55  ;;  %v499_v8 = vadd.s32 536870912, %v498_v60 }
  0xc4   : > { %v362_v9 = vor.u32 %v361_v63, %v360_v36  ;;  %v365_v10 = vor.u32 %v364_v1, %v363_v54  ;;  %v382_v12 = vshll.u32 %v342_v44, 8  ;;  %v350_v13 = vshrl.u32 %v1705_v59, %v349_v47 }
  0xc5   : > { %vm366_vm14 = vcmp.lt.s32.totalorder %v347_v45, 1  ;;  %vm368_vm15 = vcmp.lt.s32.totalorder %v347_v45, 3  ;;  %vm369_vm0 = vcmp.lt.s32.totalorder %v347_v45, 4  ;;  %v1966_v14 = vshrl.u32 %v499_v8, 30 }
  0xc6   : > { %v371_v15 = vsel %vm369_vm0, %v359_v7, 2102212464  ;;  %v374_v16 = vsel %vm366_vm14, %v353_v62, %v356_v6  ;;  %v375_v17 = vsel %vm369_vm0, %v362_v9, 920167782  ;;  %v1458_v19 = vmin.u32 %v608_v5, %v1945_v48 }
  0xc7   : > { %vm367_vm1 = vcmp.lt.s32.totalorder %v347_v45, 2  ;;  %v376_v20 = vsel %vm368_vm15, %v359_v7, %v375_v17  ;;  %v378_v21 = vsel %vm366_vm14, %v356_v6, %v359_v7  ;;  %v501_v22 = vshll.u32 %v1966_v14, 30 }
  0xc8   : > { %v370_v23 = vsel %vm366_vm14, %v350_v13, %v353_v62  ;;  %v377_v24 = vsel %vm367_vm1, %v374_v16, %v376_v20  ;;  %v379_v26 = vsel %vm369_vm0, %v365_v10, 1326507024  ;;  %v372_v31 = vsel %vm368_vm15, %v356_v6, %v371_v15 }
  0xc9   : > { %v380_v32 = vsel %vm368_vm15, %v362_v9, %v379_v26  ;;  %v1971_v34 = vmul.u32.u64.low %v382_v12, %v377_v24  ;;  %v1972_v28 = vmul.u32.u64.high %v382_v12, %v377_v24, %v1971_v34  ;;  %v1975_v41 = vsub.s32 %v498_v60, %v501_v22 }
  0xca   : > { %v381_v44 = vsel %vm367_vm1, %v378_v21, %v380_v32  ;;  %v1979_v47 = vshrl.u32 %v1865_v51, 5  ;;  %v653_v49 = vand.u32 8388607, %v646_v39  ;;  %v664_v50 = vshrl.u32 %v1706_v61, %v1962_v3 }
  0xcb   : > { %v667_v52 = vshrl.u32 %v1707_v0, %v1962_v3  ;;  %v504_v53 = vsub.s32 0, %v1975_v41  ;;  %v373_v55 = vsel %vm367_vm1, %v370_v23, %v372_v31  ;;  %v610_v56 = vclz %v1458_v19 }
  0xcc   : > { %v1989_v36 = vmul.u32.u64.low %v382_v12, %v381_v44  ;;  %v1990_v57 = vmul.u32.u64.high %v382_v12, %v381_v44, %v1989_v36  ;;  %v392_v51 = vadd.s32 1, %v1972_v28  ;;  %v663_v58 = vshll.u32 %v1705_v59, %v1939_v35 }
  0xcd   : > { %v670_v54 = vshrl.u32 %v1708_v2, %v1962_v3  ;;  %v1454_v60 = vmin.u32 %v504_v53, %v1975_v41  ;;  %v666_v62 = vshll.u32 %v1706_v61, %v1939_v35  ;;  %v672_v45 = vshll.u32 %v1708_v2, %v1939_v35 }
  0xce   : > { %v673_v63 = vshrl.u32 %v1709_v4, %v1962_v3  ;;  %v389_v1 = vmul.u32 %v382_v12, %v373_v55  ;;  %v665_v5 = vor.u32 %v664_v50, %v663_v58  ;;  %v669_v6 = vshll.u32 %v1707_v0, %v1939_v35 }
  0xcf   : > { %v676_v7 = vshrl.u32 %v1710_v11, %v1962_v3  ;;  %v506_v8 = vclz %v1454_v60  ;;  %vm391_vm2 = vc.u32 %v1990_v57, %v1971_v34  ;;  %v668_v9 = vor.u32 %v667_v52, %v666_v62 }
  0xd0   : > { %v674_v10 = vor.u32 %v673_v63, %v672_v45  ;;  %v1459_v13 = vadd.s32 4294967294, %v610_v56  ;;  %v393_v15 = vsel %vm391_vm2, %v392_v51, %v1972_v28  ;;  %v671_v16 = vor.u32 %v670_v54, %v669_v6 }
  0xd1   : > { %v675_v12 = vshll.u32 %v1709_v4, %v1939_v35  ;;  %v394_v17 = vadd.s32 %v393_v15, %v389_v1  ;;  %v654_v19 = vor.u32 8388608, %v653_v49  ;;  %v1455_v20 = vadd.s32 4294967294, %v506_v8 }
  0xd2   : > { %vm678_vm3 = vcmp.lt.s32.totalorder %v1979_v47, 1  ;;  %vm681_vm4 = vcmp.lt.s32.totalorder %v1979_v47, 4  ;;  %vm680_vm5 = vcmp.lt.s32.totalorder %v1979_v47, 3  ;;  %vm1460_vm6 = vcmp.lt.s32.totalorder %v1459_v13, 0 }
  0xd3   : > { %v677_v21 = vor.u32 %v676_v7, %v675_v12  ;;  %v395_v22 = vadd.s32 536870912, %v394_v17  ;;  %v686_v23 = vsel %vm678_vm3, %v665_v5, %v668_v9  ;;  %v687_v24 = vsel %vm681_vm4, %v674_v10, 920167782 }
  0xd4   : > { %v688_v35 = vsel %vm680_vm5, %v671_v16, %v687_v24  ;;  %v662_v31 = vshrl.u32 %v1705_v59, %v1962_v3  ;;  %vm679_vm7 = vcmp.lt.s32.totalorder %v1979_v47, 2  ;;  %v683_v32 = vsel %vm681_vm4, %v671_v16, 2102212464 }
  0xd5   : > { %v2022_v26 = vshrl.u32 %v395_v22, 30  ;;  %vm1456_vm8 = vcmp.lt.s32.totalorder %v1455_v20, 0  ;;  %v689_v28 = vsel %vm679_vm7, %v686_v23, %v688_v35  ;;  %v690_v44 = vsel %vm678_vm3, %v668_v9, %v671_v16 }
  0xd6   : > { %v694_v49 = vshll.u32 %v654_v19, 8  ;;  %v613_v50 = vsel %vm1460_vm6, 0, %v1459_v13  ;;  %v682_v53 = vsel %vm678_vm3, %v662_v31, %v665_v5  ;;  %v691_v3 = vsel %vm681_vm4, %v677_v21, 1326507024 }
  0xd7   : > { %v397_v52 = vshll.u32 %v2022_v26, 30  ;;  %v684_v55 = vsel %vm680_vm5, %v668_v9, %v683_v32  ;;  %v692_v36 = vsel %vm680_vm5, %v674_v10, %v691_v3  ;;  %v509_v58 = vsel %vm1456_vm8, 0, %v1455_v20 }
  0xd8   : > { %v2042_v56 = vmul.u32.u64.low %v694_v49, %v689_v28  ;;  %v2043_v51 = vmul.u32.u64.high %v694_v49, %v689_v28, %v2042_v56  ;;  %v693_v60 = vsel %vm679_vm7, %v690_v44, %v692_v36  ;;  %v618_v62 = vsub.s32 4294967266, %v613_v50 }
  0xd9   : > { %v398_v54 = vsub.s32 %v394_v17, %v397_v52  ;;  %v2048_v45 = vmul.u32.u64.low %v694_v49, %v693_v60  ;;  %v2049_v63 = vmul.u32.u64.high %v694_v49, %v693_v60, %v2048_v45  ;;  %v685_v5 = vsel %vm679_vm7, %v682_v53, %v684_v55 }
  0xda   : > { %v514_v6 = vsub.s32 4294967266, %v509_v58  ;;  %v704_v7 = vadd.s32 1, %v2043_v51  ;;  %v619_v9 = vadd.s32 127, %v618_v62  ;;  %v701_v10 = vmul.u32 %v694_v49, %v685_v5 }
  0xdb   : > { %v400_v1 = vsub.s32 0, %v398_v54  ;;  %vm703_vm9 = vc.u32 %v2049_v63, %v2042_v56  ;;  %v614_v13 = vsub.s32 32, %v613_v50  ;;  %v598_v19 = vadd.s32 %v1900_v43, %v1897_v42 }
  0xdc   : > { %v705_v16 = vsel %vm703_vm9, %v704_v7, %v2043_v51  ;;  %v515_v12 = vadd.s32 127, %v514_v6  ;;  %v620_v20 = vshll.u32 %v619_v9, 23  ;;  %v510_v21 = vsub.s32 32, %v509_v58 }
  0xdd   : > { %v1450_v8 = vmin.u32 %v400_v1, %v398_v54  ;;  %v706_v17 = vadd.s32 %v705_v16, %v701_v10  ;;  %v616_v23 = vshrl.u32 %v598_v19, %v614_v13  ;;  %v494_v24 = vadd.s32 %v1930_v30, %v1936_v33 }
  0xde   : > { %v516_v35 = vshll.u32 %v515_v12, 23  ;;  %v615_v28 = vshll.u32 %v1945_v48, %v613_v50  ;;  %v621_v49 = vor.u32 4788187, %v620_v20  ;;  %v511_v55 = vshll.u32 %v1975_v41, %v509_v58  ;;  %v750_v48 = vld [vmem:[%s2501_s3] sm:$0xff] }
  0xdf   : > { %v402_v15 = vclz %v1450_v8  ;;  %v707_v22 = vadd.s32 536870912, %v706_v17  ;;  %v512_v52 = vshrl.u32 %v494_v24, %v510_v21  ;;  %v390_v30 = vadd.s32 %v1971_v34, %v1990_v57 }
  0xe0   : > { %v617_v43 = vor.u32 %v616_v23, %v615_v28  ;;  %v517_v36 = vor.u32 4788187, %v516_v35  ;;  %v622_v50 = vand.u32 2147483647, %v621_v49  ;;  %vm778_vm11 = vcmask 261120  }
  0xe1   : > { %v1451_v47 = vadd.s32 4294967294, %v402_v15  ;;  %v2061_v32 = vshrl.u32 %v707_v22, 30  ;;  %v513_v60 = vor.u32 %v512_v52, %v511_v55  ;;  %1511 = vmatprep.mubr.msk.f32.mxu0 %vm778_vm11, %v750_v48  ;;  %v702_v12 = vadd.s32 %v2042_v56, %v2049_v63 }
  0xe2   : > { %v624_v1 = vcvt.s32.f32 %v617_v43  ;;  %v518_v5 = vand.u32 2147483647, %v517_v36  ;;  %vm544_vm13 = vcmp.lt.s32.totalorder %v1849_v27, 0  ;;  %vm440_vm14 = vcmp.lt.s32.totalorder %v1855_v37, 0 }
  0xe3   : > { %vm1452_vm10 = vcmp.lt.s32.totalorder %v1451_v47, 0  ;;  %v709_v42 = vshll.u32 %v2061_v32, 30  ;;  %v520_v34 = vcvt.s32.f32 %v513_v60  ;;  %vm2080_vm15 = vcmp.le.f32.partialorder %v542_v29, 0.7853982 }
  0xe4   : > { %v405_v31 = vsel %vm1452_vm10, 0, %v1451_v47  ;;  %v625_v58 = vmul.f32 %v624_v1, %v622_v50  ;;  %vm2091_vm0 = vcmp.le.f32.partialorder %v438_v40, 0.7853982  ;;  %vm336_vm1 = vcmp.lt.s32.totalorder %v1857_v38, 0 }
  0xe5   : > { %v410_v44 = vsub.s32 4294967266, %v405_v31  ;;  %v406_v53 = vsub.s32 32, %v405_v31  ;;  %v710_v33 = vsub.s32 %v706_v17, %v709_v42  ;;  %v407_v6 = vshll.u32 %v398_v54, %v405_v31 }
  0xe6   : > { %v521_v9 = vmul.f32 %v520_v34, %v518_v5  ;;  %v626_v15 = vxor.u32 2147483648, %v625_v58  ;;  %v628_v55 = vsub.s32 4, %v1927_v25  ;;  %vm2104_vm2 = vcmp.le.f32.partialorder %v334_v46, 0.7853982 }
  0xe7   : > { %v411_v3 = vadd.s32 127, %v410_v44  ;;  %v408_v62 = vshrl.u32 %v390_v30, %v406_v53  ;;  %v712_v45 = vsub.s32 0, %v710_v33  ;;  %v524_v36 = vsub.s32 4, %v1966_v14 }
  0xe8   : > { %v522_v19 = vxor.u32 2147483648, %v521_v9  ;;  %v627_v21 = vsel %vm544_vm13, %v626_v15, %v625_v58  ;;  %vm648_vm3 = vcmp.lt.s32.totalorder %v1846_v18, 0  ;;  %vm2116_vm4 = vcmp.le.f32.partialorder %v646_v39, 0.7853982 }
  0xe9   : > { %v412_v51 = vshll.u32 %v411_v3, 23  ;;  %v1462_v41 = vmin.u32 %v712_v45, %v710_v33  ;;  %v409_v57 = vor.u32 %v408_v62, %v407_v6  ;;  %v630_v44 = vsel %vm2080_vm15, %v1849_v27, %v627_v21 }
  0xea   : > { %v523_v56 = vsel %vm440_vm14, %v522_v19, %v521_v9  ;;  %1610 = vcosq.f32 %v630_v44  ;;  %v629_v50 = vsel %vm544_vm13, %v628_v55, %v1927_v25  ;;  %v525_v62 = vsel %vm440_vm14, %v524_v36, %v1966_v14  ;;  %v751_v36 = vld [vmem:[%s2501_s3 + $0x8] sm:$0xff] }
  0xeb   : > { %v413_v7 = vor.u32 4788187, %v412_v51  ;;  %v714_v8 = vclz %v1462_v41  ;;  %v416_v16 = vcvt.s32.f32 %v409_v57  ;;  %v526_v29 = vsel %vm2091_vm0, %v1855_v37, %v523_v56 }
  0xec   : > { %1612 = vsinq.f32 %v630_v44  ;;  %v732_v51 = vsub.s32 4, %v2061_v32  ;;  %v420_v45 = vsub.s32 4, %v2022_v26  ;;  %v631_v1 = vsel %vm2080_vm15, 0, %v629_v50 }
  0xed   : > { %v414_v10 = vand.u32 2147483647, %v413_v7  ;;  %v1463_v13 = vadd.s32 4294967294, %v714_v8  ;;  %1614 = vcosq.f32 %v526_v29  ;;  %v527_v25 = vsel %vm2091_vm0, 0, %v525_v62 }
  0xee   : > { %1616 = vsinq.f32 %v526_v29  ;;  %v733_v39 = vsel %vm648_vm3, %v732_v51, %v2061_v32  ;;  %v635_v6 = vadd.s32 3, %v631_v1  ;;  %v421_v14 = vsel %vm336_vm1, %v420_v45, %v2022_v26  ;;  %v771_v51 = vpop.permute.xlu1 %770 }
  0xef   : > { %vm1464_vm12 = vcmp.lt.s32.totalorder %v1463_v13, 0  ;;  %v417_v54 = vmul.f32 %v416_v16, %v414_v10  ;;  %v735_v5 = vsel %vm2116_vm4, 0, %v733_v39  ;;  %v531_v32 = vadd.s32 3, %v527_v25 }
  0xf0   : > { %v717_v17 = vsel %vm1464_vm12, 0, %v1463_v13  ;;  %v739_v58 = vadd.s32 3, %v735_v5  ;;  %v423_v57 = vsel %vm2104_vm2, 0, %v421_v14  ;;  %v636_v9 = vand.u32 3, %v635_v6 }
  0xf1   : > { %v718_v47 = vsub.s32 32, %v717_v17  ;;  %v722_v20 = vsub.s32 4294967266, %v717_v17  ;;  %v719_v22 = vshll.u32 %v710_v33, %v717_v17  ;;  %v418_v63 = vxor.u32 2147483648, %v417_v54 }
  0xf2   : > { %v532_v15 = vand.u32 3, %v531_v32  ;;  %v740_v16 = vand.u32 3, %v739_v58  ;;  %v427_v17 = vadd.s32 3, %v423_v57  ;;  %vm637_vm5 = vcmp.lt.s32.totalorder %v636_v9, 2 }
  0xf3   : > { %v720_v23 = vshrl.u32 %v702_v12, %v718_v47  ;;  %v723_v24 = vadd.s32 127, %v722_v20  ;;  %v419_v53 = vsel %vm336_vm1, %v418_v63, %v417_v54  ;;  %vm638_vm6 = vcmp.eq.s32.totalorder %v636_v9, 0 }
  0xf4   : > { %v422_v30 = vsel %vm2104_vm2, %v1857_v38, %v419_v53  ;;  %vm641_vm7 = vcmp.eq.s32.totalorder %v636_v9, 2  ;;  %vm534_vm8 = vcmp.eq.s32.totalorder %v532_v15, 0  ;;  %vm537_vm9 = vcmp.eq.s32.totalorder %v532_v15, 2 }
  0xf5   : > { %v721_v31 = vor.u32 %v720_v23, %v719_v22  ;;  %v724_v28 = vshll.u32 %v723_v24, 23  ;;  %1618 = vcosq.f32 %v422_v30  ;;  %vm745_vm10 = vcmp.eq.s32.totalorder %v740_v16, 2 }
  0xf6   : > { %1620 = vsinq.f32 %v422_v30  ;;  %v428_v35 = vand.u32 3, %v427_v17  ;;  %vm738_vm12 = vweird.f32 %v1846_v18  ;;  %vm742_vm13 = vcmp.eq.s32.totalorder %v740_v16, 0 }
  0xf7   : > { %v725_v49 = vor.u32 4788187, %v724_v28  ;;  %v728_v43 = vcvt.s32.f32 %v721_v31  ;;  %v1611_v7 = vpop.eup %1610  ;;  %vm741_vm14 = vcmp.lt.s32.totalorder %v740_v16, 2  ;;  %vm634_vm15 = vweird.f32 %v1849_v27 }
  0xf8   : > { %v642_v13 = vxor.u32 2147483648, %v1611_v7  ;;  %vm533_vm0 = vcmp.lt.s32.totalorder %v532_v15, 2  ;;  %vm430_vm1 = vcmp.eq.s32.totalorder %v428_v35, 0  ;;  %vm433_vm2 = vcmp.eq.s32.totalorder %v428_v35, 2 }
  0xf9   : > { %v726_v42 = vand.u32 2147483647, %v725_v49  ;;  %v1613_v41 = vpop.eup %1612  ;;  %v1711_v30 = vmov 0.0  }
  0xfa   : > { %v1615_v34 = vpop.eup %1614  ;;  %v639_v10 = vxor.u32 2147483648, %v1613_v41  ;;  %v643_v21 = vsel %vm641_vm7, %v642_v13, %v1613_v41  ;;  %1517 = vmatprep.subr.mxu1 %v1711_v30 }
  0xfb   : > { %v729_v3 = vmul.f32 %v728_v43, %v726_v42  ;;  %v1617_v8 = vpop.eup %1616  ;;  %v538_v12 = vxor.u32 2147483648, %v1615_v34 }
  0xfc   : > { %v535_v54 = vxor.u32 2147483648, %v1617_v8  ;;  %v640_v20 = vsel %vm638_vm6, %v1611_v7, %v639_v10 }
  0xfd   : > { %v730_v33 = vxor.u32 2147483648, %v729_v3  ;;  %v539_v24 = vsel %vm537_vm9, %v538_v12, %v1617_v8  ;;  %v644_v49 = vsel %vm637_vm5, %v640_v20, %v643_v21  ;;  %vm426_vm5 = vweird.f32 %v1857_v38  ;;  %v753_v38 = vld [vmem:[%s2501_s3 + $0x18] sm:$0xff] }
  0xfe   : > { %v536_v63 = vsel %vm534_vm8, %v1615_v34, %v535_v54  ;;  %v645_v43 = vsel %vm634_vm15, nan, %v644_v49 }
  0xff   : > { %v731_v46 = vsel %vm648_vm3, %v730_v33, %v729_v3  ;;  %v540_v53 = vsel %vm533_vm0, %v536_v63, %v539_v24  ;;  %vm530_vm3 = vweird.f32 %v1855_v37  ;;  %v752_v37 = vld [vmem:[%s2501_s3 + $0x10] sm:$0xff]  ;;  %v776_v33 = vpop.permute.xlu0 %775 }
 0x100   : > { %v734_v60 = vsel %vm2116_vm4, %v1846_v18, %v731_v46  ;;  %v541_v18 = vsel %vm530_vm3, nan, %v540_v53  ;;  %vm429_vm4 = vcmp.lt.s32.totalorder %v428_v35, 2 }
 0x101   : > { %1622 = vcosq.f32 %v734_v60 }
 0x102   : > { %1624 = vsinq.f32 %v734_v60  ;;  %v1619_v19 = vpop.eup %1618  ;;  %v761_v60 = vpop.permute.xlu1 %760 }
 0x103   : > { %v1621_v47 = vpop.eup %1620  ;;  %v434_v28 = vxor.u32 2147483648, %v1619_v19  ;;  %v766_v48 = vpop.permute.xlu0 %765 }
 0x104   : > { %v431_v31 = vxor.u32 2147483648, %v1621_v47 }
 0x105   : > { %v435_v55 = vsel %vm433_vm2, %v434_v28, %v1621_v47 }
 0x106   : > { %v432_v3 = vsel %vm430_vm1, %v1619_v19, %v431_v31 }
 0x107   : > { %v436_v40 = vsel %vm429_vm4, %v432_v3, %v435_v55 }
 0x108   : > { %v437_v27 = vsel %vm426_vm5, nan, %v436_v40 }
 0x10e   : > { %v1623_v26 = vpop.eup %1622 }
 0x10f   : > { %v1625_v22 = vpop.eup %1624  ;;  %v746_v23 = vxor.u32 2147483648, %v1623_v26 }
 0x110   : > { %v743_v56 = vxor.u32 2147483648, %v1625_v22 }
 0x111   : > { %v747_v44 = vsel %vm745_vm10, %v746_v23, %v1625_v22 }
 0x112   : > { %v744_v52 = vsel %vm742_vm13, %v1623_v26, %v743_v56 }
 0x113   : > { %v748_v29 = vsel %vm741_vm14, %v744_v52, %v747_v44 }
 0x114   : > { %v749_v42 = vsel %vm738_vm12, nan, %v748_v29 }
 0x115   : > { %1503 = vmatprep.subr.mxu0 %v749_v42 }
 0x116   : > { %1504 = vmatpush3.msra.mxu0 %v749_v42 }
 0x117   : > { %1505 = vmatprep.subr.mxu0 %v645_v43 }
 0x118   : > { %1506 = vmatpush3.msra.mxu0 %v645_v43 }
 0x119   : > { %1507 = vmatprep.subr.mxu0 %v541_v18 }
 0x11a   : > { %1508 = vmatpush3.msra.mxu0 %v541_v18 }
 0x11b   : > { %1509 = vmatprep.subr.mxu0 %v437_v27 }
 0x11c   : > { %1510 = vmatpush3.msra.mxu0 %v437_v27 }
 0x11d   : > { %1512 = vmatmul.mubr.msk.f32.vlgmr.msra.gmra.mxu0 %vm778_vm11, %v751_v36 }
 0x11e   : > { %1514 = vmatprep.mubr.msk.f32.mxu0 %vm778_vm11, %v752_v37 }
 0x121   : > { %1515 = vmatmul.mubr.msk.f32.gmra.mxu0 %vm778_vm11, %v753_v38 }
 0x1dd   : > { %v1513_v46 = vpop.f32.mrf.mxu0 }
 0x1de   : > { %v2160_v50 = vadd.f32 %v1513_v46, %v766_v48 }
 0x1df   : > { %v857_v62 = vpop.f32.mrf.mxu0 }
 0x1e0   : > { %v980_v39 = vand.u32 2147483647, %v2160_v50  ;;  %v983_v45 = vand.u32 2139095040, %v2160_v50  ;;  %v2164_v1 = vadd.f32 %v857_v62, %v761_v60 }
 0x1e1   : > { %v1516_v25 = vpop.f32.mrf.mxu0 }
 0x1e2   : > { %v984_v5 = vshrl.u32 %v983_v45, 23  ;;  %v876_v6 = vand.u32 2147483647, %v2164_v1  ;;  %v987_v14 = vand.u32 8388607, %v980_v39  ;;  %v879_v7 = vand.u32 2139095040, %v2164_v1 }
 0x1e3   : > { %v2170_v32 = vadd.f32 %v1516_v25, %v776_v33  ;;  %v867_v41 = vpop.f32.mrf.mxu0 }
 0x1e4   : > { %v1473_v58 = vadd.s32 4294967169, %v984_v5  ;;  %v883_v34 = vand.u32 8388607, %v876_v6  ;;  %v2174_v57 = vadd.f32 %v867_v41, %v771_v51  ;;  %v880_v8 = vshrl.u32 %v879_v7, 23 }
 0x1e5   : > { %v1191_v9 = vand.u32 2139095040, %v2170_v32  ;;  %v988_v13 = vor.u32 8388608, %v987_v14 }
 0x1e6   : > { %v990_v10 = vadd.s32 1, %v1473_v58  ;;  %v1469_v15 = vadd.s32 4294967169, %v880_v8  ;;  %v884_v16 = vor.u32 8388608, %v883_v34  ;;  %v1087_v17 = vand.u32 2139095040, %v2174_v57 }
 0x1e7   : > { %v1192_v12 = vshrl.u32 %v1191_v9, 23  ;;  %v2178_v20 = vshll.u32 %v988_v13, 8 }
 0x1e8   : > { %vm991_vm6 = vcmp.gt.s32.totalorder %v990_v10, 0  ;;  %v886_v54 = vadd.s32 1, %v1469_v15  ;;  %v2180_v21 = vshll.u32 %v884_v16, 8  ;;  %v2183_v35 = vshrl.u32 %v1087_v17, 23 }
 0x1e9   : > { %v992_v19 = vsel %vm991_vm6, %v990_v10, 0  ;;  %v1481_v22 = vadd.s32 4294967169, %v1192_v12 }
 0x1ea   : > { %v993_v47 = vshrl.u32 %v992_v19, 5  ;;  %v994_v26 = vand.u32 31, %v992_v19  ;;  %vm887_vm7 = vcmp.gt.s32.totalorder %v886_v54, 0 }
 0x1eb   : > { %v888_v18 = vsel %vm887_vm7, %v886_v54, 0  ;;  %v1198_v5 = vadd.s32 1, %v1481_v22 }
 0x1ec   : > { %v995_v23 = vsub.s32 32, %v994_v26  ;;  %v997_v24 = vshll.u32 %v1705_v59, %v994_v26  ;;  %v1000_v56 = vshll.u32 %v1706_v61, %v994_v26  ;;  %v1003_v63 = vshll.u32 %v1707_v0, %v994_v26 }
 0x1ed   : > { %v1006_v31 = vshll.u32 %v1708_v2, %v994_v26  ;;  %v1009_v28 = vshll.u32 %v1709_v4, %v994_v26  ;;  %vm1012_vm8 = vcmp.lt.s32.totalorder %v993_v47, 1  ;;  %vm1014_vm9 = vcmp.lt.s32.totalorder %v993_v47, 3 }
 0x1ee   : > { %v998_v44 = vshrl.u32 %v1706_v61, %v995_v23  ;;  %v1001_v49 = vshrl.u32 %v1707_v0, %v995_v23  ;;  %v1004_v52 = vshrl.u32 %v1708_v2, %v995_v23  ;;  %v996_v29 = vshrl.u32 %v1705_v59, %v995_v23 }
 0x1ef   : > { %v1007_v53 = vshrl.u32 %v1709_v4, %v995_v23  ;;  %v1010_v42 = vshrl.u32 %v1710_v11, %v995_v23  ;;  %vm1015_vm10 = vcmp.lt.s32.totalorder %v993_v47, 4  ;;  %v890_v36 = vand.u32 31, %v888_v18 }
 0x1f0   : > { %v999_v43 = vor.u32 %v998_v44, %v997_v24  ;;  %v1002_v3 = vor.u32 %v1001_v49, %v1000_v56  ;;  %v1005_v55 = vor.u32 %v1004_v52, %v1003_v63  ;;  %vm1013_vm12 = vcmp.lt.s32.totalorder %v993_v47, 2 }
 0x1f1   : > { %v1008_v40 = vor.u32 %v1007_v53, %v1006_v31  ;;  %v1011_v27 = vor.u32 %v1010_v42, %v1009_v28  ;;  %v891_v62 = vsub.s32 32, %v890_v36  ;;  %v889_v58 = vshrl.u32 %v888_v18, 5 }
 0x1f2   : > { %v1016_v37 = vsel %vm1012_vm8, %v996_v29, %v999_v43  ;;  %v1017_v38 = vsel %vm1015_vm10, %v1005_v55, 2102212464  ;;  %v1020_v33 = vsel %vm1012_vm8, %v999_v43, %v1002_v3  ;;  %v1024_v51 = vsel %vm1012_vm8, %v1002_v3, %v1005_v55 }
 0x1f3   : > { %v1018_v48 = vsel %vm1014_vm9, %v1002_v3, %v1017_v38  ;;  %v1021_v46 = vsel %vm1015_vm10, %v1008_v40, 920167782  ;;  %v1025_v60 = vsel %vm1015_vm10, %v1011_v27, 1326507024  ;;  %v893_v13 = vshll.u32 %v1705_v59, %v890_v36 }
 0x1f4   : > { %v1022_v45 = vsel %vm1014_vm9, %v1005_v55, %v1021_v46  ;;  %v1026_v25 = vsel %vm1014_vm9, %v1008_v40, %v1025_v60  ;;  %v1019_v14 = vsel %vm1013_vm12, %v1016_v37, %v1018_v48  ;;  %v894_v15 = vshrl.u32 %v1706_v61, %v891_v62 }
 0x1f5   : > { %v1023_v7 = vsel %vm1013_vm12, %v1020_v33, %v1022_v45  ;;  %v1027_v41 = vsel %vm1013_vm12, %v1024_v51, %v1026_v25  ;;  %v896_v16 = vshll.u32 %v1706_v61, %v890_v36  ;;  %v897_v12 = vshrl.u32 %v1707_v0, %v891_v62 }
 0x1f6   : > { %v2203_v34 = vmul.u32.u64.low %v2178_v20, %v1027_v41  ;;  %v2204_v8 = vmul.u32.u64.high %v2178_v20, %v1027_v41, %v2203_v34  ;;  %v2207_v9 = vmul.u32.u64.low %v2178_v20, %v1023_v7  ;;  %v2208_v10 = vmul.u32.u64.high %v2178_v20, %v1023_v7, %v2207_v9 }
 0x1f7   : > { %v899_v17 = vshll.u32 %v1707_v0, %v890_v36  ;;  %v900_v19 = vshrl.u32 %v1708_v2, %v891_v62  ;;  %v902_v54 = vshll.u32 %v1708_v2, %v890_v36  ;;  %v903_v47 = vshrl.u32 %v1709_v4, %v891_v62 }
 0x1f8   : > { %v895_v26 = vor.u32 %v894_v15, %v893_v13  ;;  %v898_v22 = vor.u32 %v897_v12, %v896_v16  ;;  %v905_v23 = vshll.u32 %v1709_v4, %v890_v36  ;;  %v906_v24 = vshrl.u32 %v1710_v11, %v891_v62 }
 0x1f9   : > { %v1035_v56 = vmul.u32 %v2178_v20, %v1019_v14  ;;  %vm1037_vm13 = vc.u32 %v2204_v8, %v2207_v9  ;;  %v1038_v63 = vadd.s32 1, %v2208_v10  ;;  %v901_v31 = vor.u32 %v900_v19, %v899_v17 }
 0x1fa   : > { %v892_v28 = vshrl.u32 %v1705_v59, %v891_v62  ;;  %v904_v44 = vor.u32 %v903_v47, %v902_v54  ;;  %v907_v49 = vor.u32 %v906_v24, %v905_v23  ;;  %vm908_vm14 = vcmp.lt.s32.totalorder %v889_v58, 1 }
 0x1fb   : > { %v1039_v52 = vsel %vm1037_vm13, %v1038_v63, %v2208_v10  ;;  %vm910_vm15 = vcmp.lt.s32.totalorder %v889_v58, 3  ;;  %vm911_vm0 = vcmp.lt.s32.totalorder %v889_v58, 4  ;;  %v916_v29 = vsel %vm908_vm14, %v895_v26, %v898_v22 }
 0x1fc   : > { %v1040_v53 = vadd.s32 %v1039_v52, %v1035_v56  ;;  %v913_v42 = vsel %vm911_vm0, %v901_v31, 2102212464  ;;  %v917_v43 = vsel %vm911_vm0, %v904_v44, 920167782  ;;  %v920_v20 = vsel %vm908_vm14, %v898_v22, %v901_v31 }
 0x1fd   : > { %vm909_vm1 = vcmp.lt.s32.totalorder %v889_v58, 2  ;;  %v918_v3 = vsel %vm910_vm15, %v901_v31, %v917_v43  ;;  %v921_v55 = vsel %vm911_vm0, %v907_v49, 1326507024  ;;  %v1477_v18 = vadd.s32 4294967169, %v2183_v35 }
 0x1fe   : > { %v912_v40 = vsel %vm908_vm14, %v892_v28, %v895_v26  ;;  %v914_v27 = vsel %vm910_vm15, %v898_v22, %v913_v42  ;;  %v919_v36 = vsel %vm909_vm1, %v916_v29, %v918_v3  ;;  %v922_v37 = vsel %vm910_vm15, %v904_v44, %v921_v55 }
 0x1ff   : > { %v923_v38 = vsel %vm909_vm1, %v920_v20, %v922_v37  ;;  %v2229_v33 = vmul.u32.u64.low %v2180_v21, %v919_v36  ;;  %v2230_v51 = vmul.u32.u64.high %v2180_v21, %v919_v36, %v2229_v33  ;;  %vm1199_vm2 = vcmp.gt.s32.totalorder %v1198_v5, 0 }
 0x200   : > { %v1041_v48 = vadd.s32 536870912, %v1040_v53  ;;  %v2234_v46 = vmul.u32.u64.low %v2180_v21, %v923_v38  ;;  %v2235_v60 = vmul.u32.u64.high %v2180_v21, %v923_v38, %v2234_v46  ;;  %v915_v62 = vsel %vm909_vm1, %v912_v40, %v914_v27 }
 0x201   : > { %v1094_v45 = vadd.s32 1, %v1477_v18  ;;  %v1200_v25 = vsel %vm1199_vm2, %v1198_v5, 0  ;;  %v934_v35 = vadd.s32 1, %v2230_v51  ;;  %v931_v7 = vmul.u32 %v2180_v21, %v915_v62 }
 0x202   : > { %v2238_v14 = vshrl.u32 %v1041_v48, 30  ;;  %vm933_vm3 = vc.u32 %v2235_v60, %v2229_v33  ;;  %v1084_v41 = vand.u32 2147483647, %v2174_v57  ;;  %v2245_v34 = vand.u32 31, %v1200_v25 }
 0x203   : > { %v935_v58 = vsel %vm933_vm3, %v934_v35, %v2230_v51  ;;  %vm1095_vm4 = vcmp.gt.s32.totalorder %v1094_v45, 0  ;;  %v1188_v26 = vand.u32 2147483647, %v2170_v32  ;;  %v2271_v55 = vshrl.u32 %v1200_v25, 5 }
 0x204   : > { %v936_v10 = vadd.s32 %v935_v58, %v931_v7  ;;  %v1096_v13 = vsel %vm1095_vm4, %v1094_v45, 0  ;;  %v1043_v5 = vshll.u32 %v2238_v14, 30  ;;  %v1091_v12 = vand.u32 8388607, %v1084_v41 }
 0x205   : > { %v1098_v15 = vand.u32 31, %v1096_v13  ;;  %v2251_v21 = vsub.s32 32, %v2245_v34  ;;  %v1097_v52 = vshrl.u32 %v1096_v13, 5  ;;  %v2275_v27 = vand.u32 8388607, %v1188_v26 }
 0x206   : > { %v937_v16 = vadd.s32 536870912, %v936_v10  ;;  %v2258_v22 = vsub.s32 %v1040_v53, %v1043_v5  ;;  %v1092_v23 = vor.u32 8388608, %v1091_v12  ;;  %v1214_v37 = vshll.u32 %v1708_v2, %v2245_v34 }
 0x207   : > { %v1099_v17 = vsub.s32 32, %v1098_v15  ;;  %v1215_v63 = vshrl.u32 %v1709_v4, %v2251_v21  ;;  %v1101_v31 = vshll.u32 %v1705_v59, %v1098_v15  ;;  %v1104_v28 = vshll.u32 %v1706_v61, %v1098_v15 }
 0x208   : > { %v2253_v19 = vshrl.u32 %v937_v16, 30  ;;  %v1110_v44 = vshll.u32 %v1708_v2, %v1098_v15  ;;  %v1107_v29 = vshll.u32 %v1707_v0, %v1098_v15  ;;  %v1113_v3 = vshll.u32 %v1709_v4, %v1098_v15 }
 0x209   : > { %v1102_v54 = vshrl.u32 %v1706_v61, %v1099_v17  ;;  %v1105_v47 = vshrl.u32 %v1707_v0, %v1099_v17  ;;  %v1108_v24 = vshrl.u32 %v1708_v2, %v1099_v17  ;;  %v1111_v56 = vshrl.u32 %v1709_v4, %v1099_v17 }
 0x20a   : > { %v939_v49 = vshll.u32 %v2253_v19, 30  ;;  %v1114_v53 = vshrl.u32 %v1710_v11, %v1099_v17  ;;  %v1132_v40 = vshll.u32 %v1092_v23, 8  ;;  %v1046_v36 = vsub.s32 0, %v2258_v22 }
 0x20b   : > { %v1103_v42 = vor.u32 %v1102_v54, %v1101_v31  ;;  %v1106_v43 = vor.u32 %v1105_v47, %v1104_v28  ;;  %v1112_v20 = vor.u32 %v1111_v56, %v1110_v44  ;;  %v1109_v18 = vor.u32 %v1108_v24, %v1107_v29 }
 0x20c   : > { %v1217_v38 = vshll.u32 %v1709_v4, %v2245_v34  ;;  %v1115_v51 = vor.u32 %v1114_v53, %v1113_v3  ;;  %v2282_v48 = vsub.s32 %v936_v10, %v939_v49  ;;  %v1218_v46 = vshrl.u32 %v1710_v11, %v2251_v21 }
 0x20d   : > { %vm1116_vm5 = vcmp.lt.s32.totalorder %v1097_v52, 1  ;;  %vm1119_vm6 = vcmp.lt.s32.totalorder %v1097_v52, 4  ;;  %v1216_v62 = vor.u32 %v1215_v63, %v1214_v37  ;;  %v1100_v7 = vshrl.u32 %v1705_v59, %v1099_v17 }
 0x20e   : > { %v1124_v45 = vsel %vm1116_vm5, %v1103_v42, %v1106_v43  ;;  %v1125_v25 = vsel %vm1119_vm6, %v1112_v20, 920167782  ;;  %v1129_v35 = vsel %vm1119_vm6, %v1115_v51, 1326507024  ;;  %vm1118_vm7 = vcmp.lt.s32.totalorder %v1097_v52, 3 }
 0x20f   : > { %v1121_v58 = vsel %vm1119_vm6, %v1109_v18, 2102212464  ;;  %v1128_v13 = vsel %vm1116_vm5, %v1106_v43, %v1109_v18  ;;  %v1474_v15 = vmin.u32 %v1046_v36, %v2258_v22  ;;  %vm1117_vm8 = vcmp.lt.s32.totalorder %v1097_v52, 2 }
 0x210   : > { %v1126_v4 = vsel %vm1118_vm7, %v1109_v18, %v1125_v25  ;;  %v1130_v10 = vsel %vm1118_vm7, %v1112_v20, %v1129_v35  ;;  %v942_v5 = vsub.s32 0, %v2282_v48  ;;  %v1120_v16 = vsel %vm1116_vm5, %v1100_v7, %v1103_v42 }
 0x211   : > { %v1127_v11 = vsel %vm1117_vm8, %v1124_v45, %v1126_v4  ;;  %v1206_v12 = vshrl.u32 %v1706_v61, %v2251_v21  ;;  %v1122_v54 = vsel %vm1118_vm7, %v1106_v43, %v1121_v58  ;;  %v1131_v47 = vsel %vm1117_vm8, %v1128_v13, %v1130_v10 }
 0x212   : > { %v2293_v17 = vmul.u32.u64.low %v1132_v40, %v1127_v11  ;;  %v2294_v23 = vmul.u32.u64.high %v1132_v40, %v1127_v11, %v2293_v17  ;;  %v1219_v24 = vor.u32 %v1218_v46, %v1217_v38  ;;  %v1205_v31 = vshll.u32 %v1705_v59, %v2245_v34 }
 0x213   : > { %v2297_v56 = vmul.u32.u64.low %v1132_v40, %v1131_v47  ;;  %v2298_v63 = vmul.u32.u64.high %v1132_v40, %v1131_v47, %v2297_v56  ;;  %v1208_v28 = vshll.u32 %v1706_v61, %v2245_v34  ;;  %v1209_v44 = vshrl.u32 %v1707_v0, %v2251_v21 }
 0x214   : > { %v1211_v49 = vshll.u32 %v1707_v0, %v2245_v34  ;;  %v1212_v29 = vshrl.u32 %v1708_v2, %v2251_v21  ;;  %v1048_v53 = vclz %v1474_v15  ;;  %v1470_v42 = vmin.u32 %v942_v5, %v2282_v48 }
 0x215   : > { %vm1223_vm9 = vcmp.lt.s32.totalorder %v2271_v55, 4  ;;  %v1123_v43 = vsel %vm1117_vm8, %v1120_v16, %v1122_v54  ;;  %v1142_v20 = vadd.s32 1, %v2294_v23  ;;  %v1207_v3 = vor.u32 %v1206_v12, %v1205_v31 }
 0x216   : > { %v1210_v61 = vor.u32 %v1209_v44, %v1208_v28  ;;  %v1213_v18 = vor.u32 %v1212_v29, %v1211_v49  ;;  %v1229_v36 = vsel %vm1223_vm9, %v1216_v62, 920167782  ;;  %v1233_v0 = vsel %vm1223_vm9, %v1219_v24, 1326507024 }
 0x217   : > { %v1139_v34 = vmul.u32 %v1132_v40, %v1123_v43  ;;  %vm1141_vm10 = vc.u32 %v2298_v63, %v2293_v17  ;;  %v1196_v2 = vor.u32 8388608, %v2275_v27  ;;  %v944_v37 = vclz %v1470_v42 }
 0x218   : > { %v1143_v52 = vsel %vm1141_vm10, %v1142_v20, %v2294_v23  ;;  %vm1220_vm12 = vcmp.lt.s32.totalorder %v2271_v55, 1  ;;  %vm1222_vm13 = vcmp.lt.s32.totalorder %v2271_v55, 3  ;;  %v1475_v38 = vadd.s32 4294967294, %v1048_v53 }
 0x219   : > { %v1144_v51 = vadd.s32 %v1143_v52, %v1139_v34  ;;  %v1228_v46 = vsel %vm1220_vm12, %v1207_v3, %v1210_v61  ;;  %v1230_v40 = vsel %vm1222_vm13, %v1213_v18, %v1229_v36  ;;  %v1204_v45 = vshrl.u32 %v1705_v59, %v2251_v21 }
 0x21a   : > { %vm1221_vm14 = vcmp.lt.s32.totalorder %v2271_v55, 2  ;;  %v1225_v25 = vsel %vm1223_vm9, %v1213_v18, 2102212464  ;;  %v1232_v35 = vsel %vm1220_vm12, %v1210_v61, %v1213_v18  ;;  %v1234_v7 = vsel %vm1222_vm13, %v1216_v62, %v1233_v0 }
 0x21b   : > { %v1145_v27 = vadd.s32 536870912, %v1144_v51  ;;  %v1471_v58 = vadd.s32 4294967294, %v944_v37  ;;  %v1231_v13 = vsel %vm1221_vm14, %v1228_v46, %v1230_v40  ;;  %v1235_v15 = vsel %vm1221_vm14, %v1232_v35, %v1234_v7 }
 0x21c   : > { %v1236_v59 = vshll.u32 %v1196_v2, 8  ;;  %vm1476_vm15 = vcmp.lt.s32.totalorder %v1475_v38, 0  ;;  %v1224_v4 = vsel %vm1220_vm12, %v1204_v45, %v1207_v3  ;;  %v1226_v10 = vsel %vm1222_vm13, %v1210_v61, %v1225_v25 }
 0x21d   : > { %v2341_v21 = vshrl.u32 %v1145_v27, 30  ;;  %v1051_v54 = vsel %vm1476_vm15, 0, %v1475_v38  ;;  %vm1472_vm0 = vcmp.lt.s32.totalorder %v1471_v58, 0  ;;  %v1227_v23 = vsel %vm1221_vm14, %v1224_v4, %v1226_v10 }
 0x21e   : > { %v2347_v5 = vmul.u32.u64.low %v1236_v59, %v1235_v15  ;;  %v2348_v16 = vmul.u32.u64.high %v1236_v59, %v1235_v15, %v2347_v5  ;;  %v2351_v11 = vmul.u32.u64.low %v1236_v59, %v1231_v13  ;;  %v2352_v12 = vmul.u32.u64.high %v1236_v59, %v1231_v13, %v2351_v11 }
 0x21f   : > { %v1147_v62 = vshll.u32 %v2341_v21, 30  ;;  %v1056_v24 = vsub.s32 4294967266, %v1051_v54  ;;  %v947_v56 = vsel %vm1472_vm0, 0, %v1471_v58  ;;  %v1243_v44 = vmul.u32 %v1236_v59, %v1227_v23 }
 0x220   : > { %vm1245_vm1 = vc.u32 %v2348_v16, %v2351_v11  ;;  %v1246_v28 = vadd.s32 1, %v2352_v12  ;;  %vm1712_vm2 = vmmov 0   ;;  %v952_v53 = vsub.s32 4294967266, %v947_v56 }
 0x221   : > { %v1148_v47 = vsub.s32 %v1144_v51, %v1147_v62  ;;  %1525 = vmatprep.mubr.msk.f32.mxu1 %vm1712_vm2, %v1711_v30  ;;  %v1057_v43 = vadd.s32 127, %v1056_v24  ;;  %v1052_v3 = vsub.s32 32, %v1051_v54  ;;  %v1036_v0 = vadd.s32 %v2207_v9, %v2204_v8 }
 0x222   : > { %v1247_v29 = vsel %vm1245_vm1, %v1246_v28, %v2352_v12  ;;  %v953_v18 = vadd.s32 127, %v952_v53  ;;  %v948_v2 = vsub.s32 32, %v947_v56  ;;  %v1140_v51 = vadd.s32 %v2293_v17, %v2298_v63 }
 0x223   : > { %v1150_v31 = vsub.s32 0, %v1148_v47  ;;  %v1248_v42 = vadd.s32 %v1247_v29, %v1243_v44  ;;  %v1058_v34 = vshll.u32 %v1057_v43, 23  ;;  %v1054_v38 = vshrl.u32 %v1036_v0, %v1052_v3 }
 0x224   : > { %v1053_v45 = vshll.u32 %v2258_v22, %v1051_v54  ;;  %v932_v27 = vadd.s32 %v2229_v33, %v2235_v60  ;;  %v954_v25 = vshll.u32 %v953_v18, 23  ;;  %v949_v17 = vshll.u32 %v2282_v48, %v947_v56 }
 0x225   : > { %v1478_v49 = vmin.u32 %v1150_v31, %v1148_v47  ;;  %v1249_v20 = vadd.s32 536870912, %v1248_v42  ;;  %v1059_v8 = vor.u32 4788187, %v1058_v34  ;;  %v1244_v48 = vadd.s32 %v2351_v11, %v2348_v16 }
 0x226   : > { %v950_v13 = vshrl.u32 %v932_v27, %v948_v2  ;;  %v1055_v59 = vor.u32 %v1054_v38, %v1053_v45  ;;  %v955_v63 = vor.u32 4788187, %v954_v25  ;;  %vm1086_vm5 = vcmp.lt.s32.totalorder %v2174_v57, 0 }
 0x227   : > { %v1152_v55 = vclz %v1478_v49  ;;  %v2362_v36 = vshrl.u32 %v1249_v20, 30  ;;  %v1060_v62 = vand.u32 2147483647, %v1059_v8  ;;  %vm2380_vm6 = vcmp.le.f32.partialorder %v1084_v41, 0.7853982 }
 0x228   : > { %v951_v12 = vor.u32 %v950_v13, %v949_v17  ;;  %v1062_v33 = vcvt.s32.f32 %v1055_v59  ;;  %v956_v24 = vand.u32 2147483647, %v955_v63  ;;  %vm982_vm7 = vcmp.lt.s32.totalorder %v2160_v50, 0 }
 0x229   : > { %v1479_v61 = vadd.s32 4294967294, %v1152_v55  ;;  %v1251_v52 = vshll.u32 %v2362_v36, 30  ;;  %vm878_vm8 = vcmp.lt.s32.totalorder %v2164_v1, 0  ;;  %vm2393_vm9 = vcmp.le.f32.partialorder %v980_v39, 0.7853982 }
 0x22a   : > { %v1063_v31 = vmul.f32 %v1062_v33, %v1060_v62  ;;  %v958_v44 = vcvt.s32.f32 %v951_v12  ;;  %v1170_v45 = vsub.s32 4, %v2341_v21  ;;  %vm2405_vm10 = vcmp.le.f32.partialorder %v876_v6, 0.7853982 }
 0x22b   : > { %vm1480_vm3 = vcmp.lt.s32.totalorder %v1479_v61, 0  ;;  %v1252_v35 = vsub.s32 %v1248_v42, %v1251_v52  ;;  %vm1190_vm12 = vcmp.lt.s32.totalorder %v2170_v32, 0  ;;  %v1274_v8 = vsub.s32 4, %v2362_v36 }
 0x22c   : > { %v1155_v37 = vsel %vm1480_vm3, 0, %v1479_v61  ;;  %v959_v53 = vmul.f32 %v958_v44, %v956_v24  ;;  %v1064_v43 = vxor.u32 2147483648, %v1063_v31  ;;  %vm2417_vm13 = vcmp.le.f32.partialorder %v1188_v26, 0.7853982 }
 0x22d   : > { %v1156_v46 = vsub.s32 32, %v1155_v37  ;;  %v1160_v40 = vsub.s32 4294967266, %v1155_v37  ;;  %v1157_v9 = vshll.u32 %v1148_v47, %v1155_v37  ;;  %v1254_v15 = vsub.s32 0, %v1252_v35 }
 0x22e   : > { %v960_v18 = vxor.u32 2147483648, %v959_v53  ;;  %v1065_v11 = vsel %vm982_vm7, %v1064_v43, %v1063_v31  ;;  %v962_v26 = vsub.s32 4, %v2253_v19  ;;  %vm1280_vm14 = vweird.f32 %v2170_v32 }
 0x22f   : > { %v1158_v7 = vshrl.u32 %v1140_v51, %v1156_v46  ;;  %v1161_v58 = vadd.s32 127, %v1160_v40  ;;  %v1482_v5 = vmin.u32 %v1254_v15, %v1252_v35  ;;  %v1068_v46 = vsel %vm2393_vm9, %v2160_v50, %v1065_v11 }
 0x230   : > { %v961_v41 = vsel %vm878_vm8, %v960_v18, %v959_v53  ;;  %v1275_v15 = vsel %vm1190_vm12, %v1274_v8, %v2362_v36  ;;  %v963_v17 = vsel %vm878_vm8, %v962_v26, %v2253_v19  ;;  %vm1176_vm15 = vweird.f32 %v2174_v57 }
 0x231   : > { %v1159_v4 = vor.u32 %v1158_v7, %v1157_v9  ;;  %v1162_v10 = vshll.u32 %v1161_v58, 23  ;;  %v1256_v54 = vclz %v1482_v5  ;;  %v964_v27 = vsel %vm2405_vm10, %v2164_v1, %v961_v41 }
 0x232   : > { %v1171_v7 = vsel %vm1086_vm5, %v1170_v45, %v2341_v21  ;;  %v965_v36 = vsel %vm2405_vm10, 0, %v963_v17 }
 0x233   : > { %v1163_v22 = vor.u32 4788187, %v1162_v10  ;;  %v1166_v23 = vcvt.s32.f32 %v1159_v4  ;;  %v1483_v47 = vadd.s32 4294967294, %v1256_v54  ;;  %v1173_v59 = vsel %vm2380_vm6, 0, %v1171_v7 }
 0x234   : > { %v1277_v4 = vsel %vm2417_vm13, 0, %v1275_v15  ;;  %v1177_v10 = vadd.s32 3, %v1173_v59  ;;  %v969_v24 = vadd.s32 3, %v965_v36 }
 0x235   : > { %v1164_v60 = vand.u32 2147483647, %v1163_v22  ;;  %vm1484_vm4 = vcmp.lt.s32.totalorder %v1483_v47, 0  ;;  %v1281_v62 = vadd.s32 3, %v1277_v4 }
 0x236   : > { %v1259_v29 = vsel %vm1484_vm4, 0, %v1483_v47  ;;  %v1178_v22 = vand.u32 3, %v1177_v10 }
 0x237   : > { %v1167_v28 = vmul.f32 %v1166_v23, %v1164_v60  ;;  %v1260_v56 = vsub.s32 32, %v1259_v29  ;;  %v1264_v42 = vsub.s32 4294967266, %v1259_v29  ;;  %v1261_v20 = vshll.u32 %v1252_v35, %v1259_v29 }
 0x238   : > { %v1066_v35 = vsub.s32 4, %v2238_v14  ;;  %v1282_v31 = vand.u32 3, %v1281_v62  ;;  %vm1180_vm0 = vcmp.eq.s32.totalorder %v1178_v22, 0  ;;  %vm1183_vm1 = vcmp.eq.s32.totalorder %v1178_v22, 2 }
 0x239   : > { %v1168_v49 = vxor.u32 2147483648, %v1167_v28  ;;  %v1262_v3 = vshrl.u32 %v1244_v48, %v1260_v56  ;;  %v1265_v61 = vadd.s32 127, %v1264_v42  ;;  %vm1179_vm2 = vcmp.lt.s32.totalorder %v1178_v22, 2 }
 0x23a   : > { %v1067_v13 = vsel %vm982_vm7, %v1066_v35, %v2238_v14  ;;  %v970_v42 = vand.u32 3, %v969_v24  ;;  %vm1287_vm4 = vcmp.eq.s32.totalorder %v1282_v31, 2  ;;  %vm1283_vm7 = vcmp.lt.s32.totalorder %v1282_v31, 2 }
 0x23b   : > { %v1169_v55 = vsel %vm1086_vm5, %v1168_v49, %v1167_v28  ;;  %v1263_v0 = vor.u32 %v1262_v3, %v1261_v20  ;;  %v1266_v34 = vshll.u32 %v1265_v61, 23  ;;  %v1069_v21 = vsel %vm2393_vm9, 0, %v1067_v13 }
 0x23c   : > { %v1172_v16 = vsel %vm2380_vm6, %v2174_v57, %v1169_v55  ;;  %v1073_v5 = vadd.s32 3, %v1069_v21  ;;  %vm1284_vm5 = vcmp.eq.s32.totalorder %v1282_v31, 0  ;;  %vm972_vm9 = vcmp.eq.s32.totalorder %v970_v42, 0  ;;  %v1292_v57 = vld [vmem:[%s2503_s5] sm:$0x3] }
 0x23d   : > { %v1267_v37 = vor.u32 4788187, %v1266_v34  ;;  %v1270_v51 = vcvt.s32.f32 %v1263_v0  ;;  %1626 = vcosq.f32 %v1172_v16  ;;  %vm975_vm10 = vcmp.eq.s32.totalorder %v970_v42, 2 }
 0x23e   : > { %1628 = vsinq.f32 %v1172_v16  ;;  %v1074_v23 = vand.u32 3, %v1073_v5 }
 0x23f   : > { %v1268_v38 = vand.u32 2147483647, %v1267_v37  ;;  %1630 = vcosq.f32 %v1068_v46 }
 0x240   : > { %1632 = vsinq.f32 %v1068_v46  ;;  %vm1076_vm3 = vcmp.eq.s32.totalorder %v1074_v23, 0  ;;  %vm1079_vm6 = vcmp.eq.s32.totalorder %v1074_v23, 2  ;;  %vm1075_vm8 = vcmp.lt.s32.totalorder %v1074_v23, 2 }
 0x241   : > { %v1271_v40 = vmul.f32 %v1270_v51, %v1268_v38  ;;  %1634 = vcosq.f32 %v964_v27 }
 0x242   : > { %1636 = vsinq.f32 %v964_v27 }
 0x243   : > { %v1272_v25 = vxor.u32 2147483648, %v1271_v40 }
 0x245   : > { %v1273_v9 = vsel %vm1190_vm12, %v1272_v25, %v1271_v40  ;;  %vm971_vm12 = vcmp.lt.s32.totalorder %v970_v42, 2 }
 0x246   : > { %v1276_v58 = vsel %vm2417_vm13, %v2170_v32, %v1273_v9  ;;  %vm1072_vm13 = vweird.f32 %v2160_v50  ;;  %v1297_v50 = vpop.permute.xlu0 %1296 }
 0x247   : > { %1638 = vcosq.f32 %v1276_v58 }
 0x248   : > { %1640 = vsinq.f32 %v1276_v58 }
 0x24a   : > { %v1627_v14 = vpop.eup %1626 }
 0x24b   : > { %v1629_v63 = vpop.eup %1628  ;;  %v1184_v33 = vxor.u32 2147483648, %v1627_v14 }
 0x24c   : > { %v1631_v12 = vpop.eup %1630  ;;  %v1181_v54 = vxor.u32 2147483648, %v1629_v63 }
 0x24d   : > { %v1633_v60 = vpop.eup %1632  ;;  %v1185_v49 = vsel %vm1183_vm1, %v1184_v33, %v1629_v63  ;;  %v1080_v53 = vxor.u32 2147483648, %v1631_v12 }
 0x24e   : > { %v1635_v47 = vpop.eup %1634  ;;  %v1182_v44 = vsel %vm1180_vm0, %v1627_v14, %v1181_v54  ;;  %v1077_v29 = vxor.u32 2147483648, %v1633_v60 }
 0x24f   : > { %v1637_v28 = vpop.eup %1636  ;;  %v976_v20 = vxor.u32 2147483648, %v1635_v47  ;;  %v1186_v61 = vsel %vm1179_vm2, %v1182_v44, %v1185_v49  ;;  %v1081_v34 = vsel %vm1079_vm6, %v1080_v53, %v1633_v60 }
 0x250   : > { %v973_v55 = vxor.u32 2147483648, %v1637_v28  ;;  %v1078_v0 = vsel %vm1076_vm3, %v1631_v12, %v1077_v29  ;;  %v1187_v11 = vsel %vm1176_vm15, nan, %v1186_v61 }
 0x251   : > { %v977_v52 = vsel %vm975_vm10, %v976_v20, %v1637_v28  ;;  %v1082_v41 = vsel %vm1075_vm8, %v1078_v0, %v1081_v34 }
 0x252   : > { %v974_v37 = vsel %vm972_vm9, %v1635_v47, %v973_v55  ;;  %v1083_v32 = vsel %vm1072_vm13, nan, %v1082_v41 }
 0x253   : > { %v978_v38 = vsel %vm971_vm12, %v974_v37, %v977_v52 }
 0x254   : > { %v1639_v19 = vpop.eup %1638 }
 0x255   : > { %v1641_v48 = vpop.eup %1640  ;;  %v1288_v56 = vxor.u32 2147483648, %v1639_v19 }
 0x256   : > { %v1285_v43 = vxor.u32 2147483648, %v1641_v48 }
 0x257   : > { %v1289_v3 = vsel %vm1287_vm4, %v1288_v56, %v1641_v48 }
 0x258   : > { %v1286_v18 = vsel %vm1284_vm5, %v1639_v19, %v1285_v43 }
 0x259   : > { %v1290_v2 = vsel %vm1283_vm7, %v1286_v18, %v1289_v3 }
 0x25a   : > { %v1291_v16 = vsel %vm1280_vm14, nan, %v1290_v2  ;;  %vm968_vm14 = vweird.f32 %v2164_v1 }
 0x25b   : > { %1518 = vmatpush3.msra.mxu1 %v1291_v16  ;;  %v979_v51 = vsel %vm968_vm14, nan, %v978_v38 }
 0x25c   : > { %1519 = vmatprep.subr.mxu1 %v1711_v30 }
 0x25d   : > { %1520 = vmatpush3.msra.mxu1 %v1187_v11 }
 0x25e   : > { %1521 = vmatprep.subr.mxu1 %v1711_v30 }
 0x25f   : > { %1522 = vmatpush3.msra.mxu1 %v1083_v32 }
 0x260   : > { %1523 = vmatprep.subr.mxu1 %v1711_v30 }
 0x261   : > { %1524 = vmatpush3.msra.mxu1 %v979_v51 }
 0x262   : > { %1526 = vmatmul.mubr.msk.f32.vlgmr.msra.gmra.mxu1 %vm778_vm11, %v1292_v57 }
 0x322   : > { %v1368_v46 = vpop.f32.mrf.mxu1 }
 0x323   : > { %v1369_v40 = vadd.f32 %v1368_v46, %v1297_v50 }
 0x324   : > { %v1527_v30 = vpop.f32.mrf.mxu1 }
 0x325   : > { %1372 = vst [vmem:[%s267_s14] sm:$0x3] %v1369_v40 }
 0x326   : > { %1655 = shalt.err (!%p1652_p3)
}
 0x327   : > { %s1656_s23 = scalar_lea.hbm %s2463_s18, 32  ;;  %s1660_s9 = scalar_lea.hbm %s2505_s7, 64 }
 0x328   : > { %p1657_p4 = scmp.ne.s32.totalorder %s2463_s18, %s1656_s23  ;;  %p1661_p9 = scmp.lt.s32.totalorder %s2463_s18, %s2505_s7 }
 0x329   : > { %p1662_p10 = scmp.lt.s32.totalorder %s1660_s9, %s1656_s23 }
 0x32a   : > { %p1658_p7 = pnand %p1657_p4, %p1792_p5 }
 0x32b   : > { %p1663_p11 = por %p1662_p10, %p1661_p9 }
 0x32c   : > { %p1659_p8 = pneg %p1658_p7 }
 0x32e   : > { %p1664_p12 = pnand %p1663_p11, %p1659_p8 }
 0x330   : > { %1667 = shalt.err (!%p1664_p12)
}
 0x331   : > { %1560 = dma.vmem_to_hbm [thread:$0]  (%p1792_p5), %s1388_s15, 32, %s2463_s18, %s1374_s19  }
 0x332 PF: > { %p1566_p13 = scmp.ge.s32.totalorder %s1702_s27, 2  ;;  %s1399_s16 = sand.u32 1, %s1690_s24  }
 0x333   : > { %s1400_s17 = scalar_lea.sflag [#allocation3], %s1399_s16 }
 0x334   : > { %p1563_p0 = pnand %p1566_p13, %p1796_p6 }
 0x336   : > { %p1564_p1 = pneg %p1563_p0 }
 0x338   : > { %1685 = dma.done.wait (%p1564_p1), %s1400_s17, 32  }
 0x339   : > { %1687 = vsyncadd (%p1564_p1), %s1400_s17, 4294967264  ;;  %p17_p2 = scmp.ge.s32.totalorder %s1779_s30, 4   ;;  %s2524_s24 = smov %s1694_s25 }
 0x33a   : > { %s2525_s25 = smov %s1698_s26  ;;  %s2526_s26 = smov %s1790_s10 }
 0x33b   : > { %s2527_s27 = smov %s1779_s30  ;;  %19 = sbr.rel (!%p17_p2) target bundleno = 3 (0x3), region = 83 }
 0x340   :  { %1405 = vsyncpa [#allocation3], 1 }
 0x341   :  { %1407 = vsyncpa [#allocation3 + $0x1], 1 }

</bundles_post_ra>
